<compile_context>
chip_gen: v5e
topology: v5e:2x2
jax: 0.10.0
libtpu: 0.0.40
codegen_flags: <defaults>
</compile_context>

<pallas_src>
import functools

import jax
import jax.numpy as jnp
from jax.experimental import pallas as pl
from jax.experimental.pallas import tpu as pltpu


def _epnet_kernel(fd_ref, fg_ref, w1d_ref, w1g_ref, b1_ref, w2_ref, b2_ref,
                  out_ref, *, gamma):
    fd = fd_ref[...]
    fg = fg_ref[...]

    # h = relu(f_d @ W1_d + f_g @ W1_g + b1): two MXU pushes into one f32
    # accumulator -- the kernel never concatenates along the lane axis.
    h = jnp.dot(fd, w1d_ref[...], preferred_element_type=jnp.float32)
    h = h + jnp.dot(fg, w1g_ref[...], preferred_element_type=jnp.float32)
    h = jnp.maximum(h + b1_ref[...], 0.0)

    # Second Linear.  Cast the hidden activations back to the weight dtype so a
    # bf16 weight path stays a native single-pass bf16 MXU op (f32 accumulate).
    logits = jnp.dot(h.astype(w2_ref.dtype), w2_ref[...],
                     preferred_element_type=jnp.float32) + b2_ref[...]

    # Gate epilogue stays in f32 (sigmoid lowers to the EUP; v5e has no bf16
    # VPU/EUP path).  gamma is a folded constant.
    gate = gamma * jax.nn.sigmoid(logits)
    out_ref[...] = (gate * fg.astype(jnp.float32)).astype(out_ref.dtype)


def _block_diag(w, r):
    """(K, N) -> (r*K, r*N) with `w` on the r diagonal blocks (zeros elsewhere)."""
    if r == 1:
        return w
    K, N = w.shape
    eye = jnp.eye(r, dtype=w.dtype)
    return (eye[:, None, :, None] * w[None, :, None, :]).reshape(r * K, r * N)


def _fold_factor(dg, dd, hidden, itemsize, max_weight_bytes=4 << 20, max_rh=512):
    """Lane-fold factor r (pack r batch rows into one 128-lane row).

    Capped so the block-diagonal weights (which grow ~r^2) and the folded
    hidden width r*H stay MXU/VMEM friendly for small Dg or large H.
    """
    if dg >= 128 or 128 % dg != 0:
        return 1
    r = 128 // dg                      # power of two, since dg divides 128
    while r > 1:
        w_elems = (r * dd) * (r * hidden) + (r * dg) * (r * hidden) \
            + (r * hidden) * (r * dg)
        if r * hidden <= max_rh and w_elems * itemsize <= max_weight_bytes:
            break
        r //= 2
    return r


def _round_up(x, m):
    return -(-x // m) * m


def _choose_grid(bf, target_tbf, step):
    """Return (folded rows per tile, number of grid steps).

    Small batches collapse to one step per TensorCore (grid length 1 or 2);
    large batches use an even grid of >= 4 steps (>= 2 per core on dual-TC
    chips) so the activation DMAs stay double-buffered, with each step moving
    ~target_tbf folded rows to amortize the ~0.35 us/step pipeline overhead.
    A partial final block (bf not a multiple of tbf) is handled by Pallas with
    masked edge stores.
    """
    target_tbf = _round_up(max(step, target_tbf), step)
    if bf <= step:
        return bf, 1                               # single tiny tile
    if bf <= 2 * target_tbf:                       # one step per TensorCore
        tbf = min(_round_up(-(-bf // 2), step), bf)
        return tbf, -(-bf // tbf)
    n = max(4, -(-bf // target_tbf))
    n += n % 2                                     # even step count (megacore balance)
    tbf = min(_round_up(-(-bf // n), step), bf)
    return tbf, -(-bf // tbf)


def epnet_forward(f_d, f_g, w1, b1, w2, b2, gamma=2.0, block_rows=4096,
                  alias_fg_into_output=False):
    """EPNet forward.

    f_d: [B, Dd], f_g: [B, Dg]  (same float dtype; bf16 halves HBM traffic)
    w1:  [Dd+Dg, H], b1: [H] / [1, H];  w2: [H, Dg], b2: [Dg] / [1, Dg]
    Returns [B, Dg] in f_g.dtype.  Wrap in jax.jit in production so the
    wrapper-side weight folding / reshapes fuse and fold once.
    """
    B, Dd = f_d.shape
    Bg, Dg = f_g.shape
    assert Bg == B, "f_d / f_g batch mismatch"
    assert f_d.dtype == f_g.dtype, "f_d / f_g must share a dtype"
    Din, H = w1.shape
    assert Din == Dd + Dg and w2.shape == (H, Dg)

    act_dtype = f_d.dtype
    itemsize = jnp.dtype(act_dtype).itemsize
    sub_step = max(8, 32 // itemsize)          # sublane tile: 8 for f32, 16 for bf16

    # Weights follow the activation dtype (bf16 weights -> native bf16 MXU);
    # biases stay f32 since they are added to the f32 accumulator.
    w1 = w1.astype(act_dtype)
    w2 = jnp.asarray(w2, act_dtype)
    b1 = jnp.asarray(b1, jnp.float32).reshape(1, H)
    b2 = jnp.asarray(b2, jnp.float32).reshape(1, Dg)

    # (1) Split W1 so the kernel never concatenates along the lane axis.
    w1_d, w1_g = w1[:Dd, :], w1[Dd:, :]

    # (2) If Dg < 128 but doesn't divide 128, zero-pad the gate/output width to
    #     the next power-of-two divisor of 128 so the folded output store stays
    #     a full-lane unmasked vst.  Costs one extra pass over f_g wrapper-side;
    #     the masked-store penalty it avoids is ~4-5x on the dominant stream.
    fg_p, w1_g_p, w2_p, b2_p, Dg_p = f_g, w1_g, w2, b2, Dg
    if Dg < 128 and 128 % Dg != 0:
        Dg_p = 1 << (Dg - 1).bit_length()
        pad = Dg_p - Dg
        fg_p = jnp.pad(f_g, ((0, 0), (0, pad)))
        w1_g_p = jnp.pad(w1_g, ((0, pad), (0, 0)))
        w2_p = jnp.pad(w2, ((0, 0), (0, pad)))
        b2_p = jnp.pad(b2, ((0, 0), (0, pad)))

    # (3) Lane-fold factor (capped) + batch padding to a multiple of r (rare;
    #     costs one extra pass over the activations).
    r = _fold_factor(Dg_p, Dd, H, itemsize)
    fd_p, Bp = f_d, B
    if B % r:
        pad = r - B % r
        fd_p = jnp.pad(f_d, ((0, pad), (0, 0)))
        fg_p = jnp.pad(fg_p, ((0, pad), (0, 0)))
        Bp = B + pad
    Bf = Bp // r

    # (4) Fold-equivalent block-diagonal weights (static, wrapper-side) and the
    #     metadata-only activation fold.
    w1d_k = _block_diag(w1_d, r)                 # (r*Dd,  r*H)
    w1g_k = _block_diag(w1_g_p, r)               # (r*Dg', r*H)
    w2_k = _block_diag(w2_p, r)                  # (r*H,   r*Dg')
    b1_k = jnp.tile(b1, (1, r))                  # (1, r*H)
    b2_k = jnp.tile(b2_p, (1, r))                # (1, r*Dg')
    fd_k = fd_p.reshape(Bf, r * Dd)
    fg_k = fg_p.reshape(Bf, r * Dg_p)            # 128-lane dense when r*Dg' == 128

    # (5) Batch grid: big per-step tiles, >= 2 steps per core for large batches.
    tbf, n_steps = _choose_grid(Bf, max(sub_step, block_rows // r), sub_step)

    # (6) Explicit VMEM budget (double-buffered activation tiles + resident
    #     weights) so scaled-up configs stay inside v7x's 64 MiB physical VMEM.
    act_tile_bytes = tbf * (r * Dd + 2 * r * Dg_p) * itemsize
    const_bytes = (w1d_k.size + w1g_k.size + w2_k.size) * itemsize \
        + (b1_k.size + b2_k.size) * 4
    needed = 2 * act_tile_bytes + 2 * const_bytes
    vmem_limit = int(min(max(32 << 20, 2 * needed + (4 << 20)), 56 << 20))

    vmem = pltpu.MemorySpace.VMEM
    operands = (fd_k, fg_k, w1d_k, w1g_k, b1_k, w2_k, b2_k)

    def build(pinned_mode):
        def act_spec(cols):
            return pl.BlockSpec((tbf, cols), lambda i: (i, 0), memory_space=vmem)

        def pinned_spec(shape):
            return pl.BlockSpec(shape, lambda i: (0, 0), memory_space=vmem,
                                pipeline_mode=pinned_mode)

        return pl.pallas_call(
            functools.partial(_epnet_kernel, gamma=float(gamma)),
            out_shape=jax.ShapeDtypeStruct((Bf, r * Dg_p), f_g.dtype),
            grid=(n_steps,),
            in_specs=[
                act_spec(r * Dd),            # f_d (folded), pipelined per tile
                act_spec(r * Dg_p),          # f_g (folded), pipelined per tile
                pinned_spec(w1d_k.shape),    # resident weights / biases
                pinned_spec(w1g_k.shape),
                pinned_spec(b1_k.shape),
                pinned_spec(w2_k.shape),
                pinned_spec(b2_k.shape),
            ],
            out_specs=act_spec(r * Dg_p),
            # Opt-in only: destroys the caller's f_g buffer.
            input_output_aliases=({1: 0} if alias_fg_into_output else {}),
            compiler_params=pltpu.CompilerParams(
                dimension_semantics=("parallel",),
                vmem_limit_bytes=vmem_limit),
        )

    try:
        # Single-buffer the constant (pinned) operands: they are never re-DMA'd,
        # so the default double buffer only wastes VMEM.
        out_folded = build(pl.Buffered(1))(*operands)
    except Exception:  # pragma: no cover - jax versions without Buffered(1) pinning
        out_folded = build(None)(*operands)

    # Metadata-only unfold back to [Bp, Dg']; slice off any batch / gate padding.
    out = out_folded.reshape(Bp, Dg_p)
    if Bp != B:
        out = out[:B]
    if Dg_p != Dg:
        out = out[:, :Dg]
    return out


def _init_linear(key, fan_in, fan_out):
    # Deterministic init mimicking torch.nn.Linear's U(-1/sqrt(fan_in), +).
    kw, kb = jax.random.split(key)
    bound = 1.0 / jnp.sqrt(jnp.float32(fan_in))
    w = jax.random.uniform(kw, (fan_in, fan_out), jnp.float32, -bound, bound)
    b = jax.random.uniform(kb, (1, fan_out), jnp.float32, -bound, bound)
    return w, b


def _reference(f_d, f_g, w1, b1, w2, b2, gamma):
    x = jnp.concatenate([f_d, f_g], axis=-1)
    h = jnp.maximum(x @ w1 + b1.reshape(1, -1), 0.0)
    return gamma * jax.nn.sigmoid(h @ w2 + b2.reshape(1, -1)) * f_g


if __name__ == "__main__":
    # --- primary check: f32, Dg divides 128 (fold r=4), one grid step per core.
    B, Dd, Dg, H = 256, 16, 32, 64
    gamma = 2.0
    k_fd, k_fg, k_l1, k_l2 = jax.random.split(jax.random.PRNGKey(0), 4)
    f_d = jax.random.normal(k_fd, (B, Dd), jnp.float32)
    f_g = jax.random.normal(k_fg, (B, Dg), jnp.float32)
    w1, b1 = _init_linear(k_l1, Dd + Dg, H)
    w2, b2 = _init_linear(k_l2, H, Dg)

    out = jax.block_until_ready(epnet_forward(f_d, f_g, w1, b1, w2, b2, gamma=gamma))
    ref = _reference(f_d, f_g, w1, b1, w2, b2, gamma)
    assert out.shape == (B, Dg)
    assert jnp.allclose(out, ref, atol=1e-4, rtol=1e-4), "f32 mismatch vs reference"

    # --- secondary check: bf16 activations/weights (halved HBM traffic), a Dg
    #     that does not divide 128 (exercises the lane-pad fallback) and a folded
    #     batch that does not divide the tile (exercises the partial last block).
    B2, Dd2, Dg2, H2 = 200, 8, 24, 48
    k_fd2, k_fg2, k_l12, k_l22 = jax.random.split(jax.random.PRNGKey(1), 4)
    f_d2 = jax.random.normal(k_fd2, (B2, Dd2), jnp.float32)
    f_g2 = jax.random.normal(k_fg2, (B2, Dg2), jnp.float32)
    w1_2, b1_2 = _init_linear(k_l12, Dd2 + Dg2, H2)
    w2_2, b2_2 = _init_linear(k_l22, H2, Dg2)

    out2 = jax.block_until_ready(
        epnet_forward(f_d2.astype(jnp.bfloat16), f_g2.astype(jnp.bfloat16),
                      w1_2, b1_2, w2_2, b2_2, gamma=1.5))
    rd = lambda a: a.astype(jnp.bfloat16).astype(jnp.float32)   # bf16-rounded ref inputs
    ref2 = _reference(rd(f_d2), rd(f_g2), rd(w1_2), b1_2, rd(w2_2), b2_2, 1.5)
    assert out2.shape == (B2, Dg2) and out2.dtype == jnp.bfloat16
    assert jnp.allclose(out2.astype(jnp.float32), ref2, atol=3e-2, rtol=3e-2), \
        "bf16 mismatch vs reference"

    print("KERNEL_OK")
</pallas_src>

<mosaic_0001>
module attributes {stable_mosaic.version = 11 : i64} {
  func.func @_epnet_kernel(%arg0: i32, %arg1: memref<32x64xf32, #tpu.memory_space<vmem>>, %arg2: memref<32x128xf32, #tpu.memory_space<vmem>>, %arg3: memref<64x256xf32, #tpu.memory_space<vmem>>, %arg4: memref<128x256xf32, #tpu.memory_space<vmem>>, %arg5: memref<1x256xf32, #tpu.memory_space<vmem>>, %arg6: memref<256x128xf32, #tpu.memory_space<vmem>>, %arg7: memref<1x128xf32, #tpu.memory_space<vmem>>, %arg8: memref<32x128xf32, #tpu.memory_space<vmem>>) attributes {dimension_semantics = [#tpu.dimension_semantics<parallel>], iteration_bounds = array<i64: 2>, scalar_prefetch = 0 : i64, scratch_operands = 0 : i64, tpu.core_type = #tpu.core_type<tc>, window_params = [{transform_indices = @transform_0, window_bounds = array<i64: 32, 64>}, {transform_indices = @transform_1, window_bounds = array<i64: 32, 128>}, {pipeline_mode = #tpu.pipeline_mode<synchronous>, transform_indices = @transform_2, window_bounds = array<i64: 64, 256>}, {pipeline_mode = #tpu.pipeline_mode<synchronous>, transform_indices = @transform_3, window_bounds = array<i64: 128, 256>}, {pipeline_mode = #tpu.pipeline_mode<synchronous>, transform_indices = @transform_4, window_bounds = array<i64: 1, 256>}, {pipeline_mode = #tpu.pipeline_mode<synchronous>, transform_indices = @transform_5, window_bounds = array<i64: 256, 128>}, {pipeline_mode = #tpu.pipeline_mode<synchronous>, transform_indices = @transform_6, window_bounds = array<i64: 1, 128>}, {transform_indices = @transform_7, window_bounds = array<i64: 32, 128>}]} {
    %c0 = arith.constant 0 : index
    %c0_0 = arith.constant 0 : index
    %0 = vector.load %arg1[%c0, %c0_0] : memref<32x64xf32, #tpu.memory_space<vmem>>, vector<32x64xf32>
    %c0_1 = arith.constant 0 : index
    %c0_2 = arith.constant 0 : index
    %1 = vector.load %arg2[%c0_1, %c0_2] : memref<32x128xf32, #tpu.memory_space<vmem>>, vector<32x128xf32>
    %c0_3 = arith.constant 0 : index
    %c0_4 = arith.constant 0 : index
    %2 = vector.load %arg3[%c0_3, %c0_4] : memref<64x256xf32, #tpu.memory_space<vmem>>, vector<64x256xf32>
    %cst = arith.constant dense<0.000000e+00> : vector<32x256xf32>
    %3 = tpu.matmul %0, %2, %cst {dimension_numbers = #tpu.dot_dimension_numbers<[1], [0], [0], [1], [0, 0, 1, 1], [], []>} : vector<32x64xf32>, vector<64x256xf32>, vector<32x256xf32> -> vector<32x256xf32>
    %c0_5 = arith.constant 0 : index
    %c0_6 = arith.constant 0 : index
    %4 = vector.load %arg4[%c0_5, %c0_6] : memref<128x256xf32, #tpu.memory_space<vmem>>, vector<128x256xf32>
    %cst_7 = arith.constant dense<0.000000e+00> : vector<32x256xf32>
    %5 = tpu.matmul %1, %4, %cst_7 {dimension_numbers = #tpu.dot_dimension_numbers<[1], [0], [0], [1], [0, 0, 1, 1], [], []>} : vector<32x128xf32>, vector<128x256xf32>, vector<32x256xf32> -> vector<32x256xf32>
    %6 = arith.addf %3, %5 : vector<32x256xf32>
    %c0_8 = arith.constant 0 : index
    %c0_9 = arith.constant 0 : index
    %7 = vector.load %arg5[%c0_8, %c0_9] : memref<1x256xf32, #tpu.memory_space<vmem>>, vector<1x256xf32>
    %8 = vector.broadcast %7 : vector<1x256xf32> to vector<32x256xf32>
    %9 = arith.addf %6, %8 : vector<32x256xf32>
    %cst_10 = arith.constant 0.000000e+00 : f32
    %10 = vector.broadcast %cst_10 : f32 to vector<32x256xf32>
    %11 = arith.maximumf %9, %10 : vector<32x256xf32>
    %c0_11 = arith.constant 0 : index
    %c0_12 = arith.constant 0 : index
    %12 = vector.load %arg6[%c0_11, %c0_12] : memref<256x128xf32, #tpu.memory_space<vmem>>, vector<256x128xf32>
    %cst_13 = arith.constant dense<0.000000e+00> : vector<32x128xf32>
    %13 = tpu.matmul %11, %12, %cst_13 {dimension_numbers = #tpu.dot_dimension_numbers<[1], [0], [0], [1], [0, 0, 1, 1], [], []>} : vector<32x256xf32>, vector<256x128xf32>, vector<32x128xf32> -> vector<32x128xf32>
    %c0_14 = arith.constant 0 : index
    %c0_15 = arith.constant 0 : index
    %14 = vector.load %arg7[%c0_14, %c0_15] : memref<1x128xf32, #tpu.memory_space<vmem>>, vector<1x128xf32>
    %15 = vector.broadcast %14 : vector<1x128xf32> to vector<32x128xf32>
    %16 = arith.addf %13, %15 : vector<32x128xf32>
    %17 = arith.negf %16 : vector<32x128xf32>
    %18 = math.exp %17 : vector<32x128xf32>
    %cst_16 = arith.constant 1.000000e+00 : f32
    %19 = vector.broadcast %cst_16 : f32 to vector<32x128xf32>
    %20 = arith.addf %19, %18 : vector<32x128xf32>
    %21 = arith.divf %19, %20 : vector<32x128xf32>
    %cst_17 = arith.constant 2.000000e+00 : f32
    %22 = vector.broadcast %cst_17 : f32 to vector<32x128xf32>
    %23 = arith.mulf %22, %21 : vector<32x128xf32>
    %24 = arith.mulf %23, %1 : vector<32x128xf32>
    %c0_18 = arith.constant 0 : index
    %c0_19 = arith.constant 0 : index
    %25 = vector.load %arg8[%c0_18, %c0_19] : memref<32x128xf32, #tpu.memory_space<vmem>>, vector<32x128xf32>
    tpu.vector_store %arg8[%c0_18, %c0_19], %24 {strides = array<i32>} : memref<32x128xf32, #tpu.memory_space<vmem>>, vector<32x128xf32>,
    return
  }
  func.func @transform_0(%arg0: i32) -> (i32, i32) {
    %c0_i32 = arith.constant 0 : i32
    %c0_i32_0 = arith.constant 0 : i32
    return %arg0, %c0_i32 : i32, i32
  }
  func.func @transform_1(%arg0: i32) -> (i32, i32) {
    %c0_i32 = arith.constant 0 : i32
    %c0_i32_0 = arith.constant 0 : i32
    return %arg0, %c0_i32 : i32, i32
  }
  func.func @transform_2(%arg0: i32) -> (i32, i32) {
    %c0_i32 = arith.constant 0 : i32
    %c0_i32_0 = arith.constant 0 : i32
    %c0_i32_1 = arith.constant 0 : i32
    return %c0_i32, %c0_i32_0 : i32, i32
  }
  func.func @transform_3(%arg0: i32) -> (i32, i32) {
    %c0_i32 = arith.constant 0 : i32
    %c0_i32_0 = arith.constant 0 : i32
    %c0_i32_1 = arith.constant 0 : i32
    return %c0_i32, %c0_i32_0 : i32, i32
  }
  func.func @transform_4(%arg0: i32) -> (i32, i32) {
    %c0_i32 = arith.constant 0 : i32
    %c0_i32_0 = arith.constant 0 : i32
    %c0_i32_1 = arith.constant 0 : i32
    return %c0_i32, %c0_i32_0 : i32, i32
  }
  func.func @transform_5(%arg0: i32) -> (i32, i32) {
    %c0_i32 = arith.constant 0 : i32
    %c0_i32_0 = arith.constant 0 : i32
    %c0_i32_1 = arith.constant 0 : i32
    return %c0_i32, %c0_i32_0 : i32, i32
  }
  func.func @transform_6(%arg0: i32) -> (i32, i32) {
    %c0_i32 = arith.constant 0 : i32
    %c0_i32_0 = arith.constant 0 : i32
    %c0_i32_1 = arith.constant 0 : i32
    return %c0_i32, %c0_i32_0 : i32, i32
  }
  func.func @transform_7(%arg0: i32) -> (i32, i32) {
    %c0_i32 = arith.constant 0 : i32
    %c0_i32_0 = arith.constant 0 : i32
    return %arg0, %c0_i32 : i32, i32
  }
}

module attributes {stable_mosaic.version = 11 : i64} {
  func.func @_epnet_kernel(%arg0: i32, %arg1: memref<32x64xf32, #tpu.memory_space<vmem>>, %arg2: memref<32x128xf32, #tpu.memory_space<vmem>>, %arg3: memref<64x256xf32, #tpu.memory_space<vmem>>, %arg4: memref<128x256xf32, #tpu.memory_space<vmem>>, %arg5: memref<1x256xf32, #tpu.memory_space<vmem>>, %arg6: memref<256x128xf32, #tpu.memory_space<vmem>>, %arg7: memref<1x128xf32, #tpu.memory_space<vmem>>, %arg8: memref<32x128xf32, #tpu.memory_space<vmem>>) attributes {dimension_semantics = [#tpu.dimension_semantics<parallel>], iteration_bounds = array<i64: 2>, scalar_prefetch = 0 : i64, scratch_operands = 0 : i64, tpu.core_type = #tpu.core_type<tc>, window_params = [{transform_indices = @transform_0, window_bounds = array<i64: 32, 64>}, {transform_indices = @transform_1, window_bounds = array<i64: 32, 128>}, {pipeline_mode = #tpu.pipeline_mode<synchronous>, transform_indices = @transform_2, window_bounds = array<i64: 64, 256>}, {pipeline_mode = #tpu.pipeline_mode<synchronous>, transform_indices = @transform_3, window_bounds = array<i64: 128, 256>}, {pipeline_mode = #tpu.pipeline_mode<synchronous>, transform_indices = @transform_4, window_bounds = array<i64: 1, 256>}, {pipeline_mode = #tpu.pipeline_mode<synchronous>, transform_indices = @transform_5, window_bounds = array<i64: 256, 128>}, {pipeline_mode = #tpu.pipeline_mode<synchronous>, transform_indices = @transform_6, window_bounds = array<i64: 1, 128>}, {transform_indices = @transform_7, window_bounds = array<i64: 32, 128>}]} {
    %c0 = arith.constant 0 : index
    %c0_0 = arith.constant 0 : index
    %0 = vector.load %arg1[%c0, %c0_0] : memref<32x64xf32, #tpu.memory_space<vmem>>, vector<32x64xf32>
    %c0_1 = arith.constant 0 : index
    %c0_2 = arith.constant 0 : index
    %1 = vector.load %arg2[%c0_1, %c0_2] : memref<32x128xf32, #tpu.memory_space<vmem>>, vector<32x128xf32>
    %c0_3 = arith.constant 0 : index
    %c0_4 = arith.constant 0 : index
    %2 = vector.load %arg3[%c0_3, %c0_4] : memref<64x256xf32, #tpu.memory_space<vmem>>, vector<64x256xf32>
    %cst = arith.constant dense<0.000000e+00> : vector<32x256xf32>
    %3 = tpu.matmul %0, %2, %cst {dimension_numbers = #tpu.dot_dimension_numbers<[1], [0], [0], [1], [0, 0, 1, 1], [], []>} : vector<32x64xf32>, vector<64x256xf32>, vector<32x256xf32> -> vector<32x256xf32>
    %c0_5 = arith.constant 0 : index
    %c0_6 = arith.constant 0 : index
    %4 = vector.load %arg4[%c0_5, %c0_6] : memref<128x256xf32, #tpu.memory_space<vmem>>, vector<128x256xf32>
    %cst_7 = arith.constant dense<0.000000e+00> : vector<32x256xf32>
    %5 = tpu.matmul %1, %4, %cst_7 {dimension_numbers = #tpu.dot_dimension_numbers<[1], [0], [0], [1], [0, 0, 1, 1], [], []>} : vector<32x128xf32>, vector<128x256xf32>, vector<32x256xf32> -> vector<32x256xf32>
    %6 = arith.addf %3, %5 : vector<32x256xf32>
    %c0_8 = arith.constant 0 : index
    %c0_9 = arith.constant 0 : index
    %7 = vector.load %arg5[%c0_8, %c0_9] : memref<1x256xf32, #tpu.memory_space<vmem>>, vector<1x256xf32>
    %8 = vector.broadcast %7 : vector<1x256xf32> to vector<32x256xf32>
    %9 = arith.addf %6, %8 : vector<32x256xf32>
    %cst_10 = arith.constant 0.000000e+00 : f32
    %10 = vector.broadcast %cst_10 : f32 to vector<32x256xf32>
    %11 = arith.maximumf %9, %10 : vector<32x256xf32>
    %c0_11 = arith.constant 0 : index
    %c0_12 = arith.constant 0 : index
    %12 = vector.load %arg6[%c0_11, %c0_12] : memref<256x128xf32, #tpu.memory_space<vmem>>, vector<256x128xf32>
    %cst_13 = arith.constant dense<0.000000e+00> : vector<32x128xf32>
    %13 = tpu.matmul %11, %12, %cst_13 {dimension_numbers = #tpu.dot_dimension_numbers<[1], [0], [0], [1], [0, 0, 1, 1], [], []>} : vector<32x256xf32>, vector<256x128xf32>, vector<32x128xf32> -> vector<32x128xf32>
    %c0_14 = arith.constant 0 : index
    %c0_15 = arith.constant 0 : index
    %14 = vector.load %arg7[%c0_14, %c0_15] : memref<1x128xf32, #tpu.memory_space<vmem>>, vector<1x128xf32>
    %15 = vector.broadcast %14 : vector<1x128xf32> to vector<32x128xf32>
    %16 = arith.addf %13, %15 : vector<32x128xf32>
    %17 = arith.negf %16 : vector<32x128xf32>
    %18 = math.exp %17 : vector<32x128xf32>
    %cst_16 = arith.constant 1.000000e+00 : f32
    %19 = vector.broadcast %cst_16 : f32 to vector<32x128xf32>
    %20 = arith.addf %19, %18 : vector<32x128xf32>
    %21 = arith.divf %19, %20 : vector<32x128xf32>
    %cst_17 = arith.constant 2.000000e+00 : f32
    %22 = vector.broadcast %cst_17 : f32 to vector<32x128xf32>
    %23 = arith.mulf %22, %21 : vector<32x128xf32>
    %24 = arith.mulf %23, %1 : vector<32x128xf32>
    %c0_18 = arith.constant 0 : index
    %c0_19 = arith.constant 0 : index
    %25 = vector.load %arg8[%c0_18, %c0_19] : memref<32x128xf32, #tpu.memory_space<vmem>>, vector<32x128xf32>
    tpu.vector_store %arg8[%c0_18, %c0_19], %24 {strides = array<i32>} : memref<32x128xf32, #tpu.memory_space<vmem>>, vector<32x128xf32>,
    return
  }
  func.func @transform_0(%arg0: i32) -> (i32, i32) {
    %c0_i32 = arith.constant 0 : i32
    %c0_i32_0 = arith.constant 0 : i32
    return %arg0, %c0_i32 : i32, i32
  }
  func.func @transform_1(%arg0: i32) -> (i32, i32) {
    %c0_i32 = arith.constant 0 : i32
    %c0_i32_0 = arith.constant 0 : i32
    return %arg0, %c0_i32 : i32, i32
  }
  func.func @transform_2(%arg0: i32) -> (i32, i32) {
    %c0_i32 = arith.constant 0 : i32
    %c0_i32_0 = arith.constant 0 : i32
    %c0_i32_1 = arith.constant 0 : i32
    return %c0_i32, %c0_i32_0 : i32, i32
  }
  func.func @transform_3(%arg0: i32) -> (i32, i32) {
    %c0_i32 = arith.constant 0 : i32
    %c0_i32_0 = arith.constant 0 : i32
    %c0_i32_1 = arith.constant 0 : i32
    return %c0_i32, %c0_i32_0 : i32, i32
  }
  func.func @transform_4(%arg0: i32) -> (i32, i32) {
    %c0_i32 = arith.constant 0 : i32
    %c0_i32_0 = arith.constant 0 : i32
    %c0_i32_1 = arith.constant 0 : i32
    return %c0_i32, %c0_i32_0 : i32, i32
  }
  func.func @transform_5(%arg0: i32) -> (i32, i32) {
    %c0_i32 = arith.constant 0 : i32
    %c0_i32_0 = arith.constant 0 : i32
    %c0_i32_1 = arith.constant 0 : i32
    return %c0_i32, %c0_i32_0 : i32, i32
  }
  func.func @transform_6(%arg0: i32) -> (i32, i32) {
    %c0_i32 = arith.constant 0 : i32
    %c0_i32_0 = arith.constant 0 : i32
    %c0_i32_1 = arith.constant 0 : i32
    return %c0_i32, %c0_i32_0 : i32, i32
  }
  func.func @transform_7(%arg0: i32) -> (i32, i32) {
    %c0_i32 = arith.constant 0 : i32
    %c0_i32_0 = arith.constant 0 : i32
    return %arg0, %c0_i32 : i32, i32
  }
}

</mosaic_0001>

<bundles_post_ra>
// kernel: tpu_custom_call.1
= control target key start
LH: loop header
LB: loop body
LE: loop exit
PB: predicated region body
PF: predicated region fallthrough
CT: control target
= control target key end

     0   :  { %s1630_s0 = inlined_call_operand.hbm [shape: f32[64,64], index: 0, kind: input, shape index: {}]   ;;  %s1631_s1 = inlined_call_operand.hbm [shape: f32[64,128], index: 1, kind: input, shape index: {}]   ;;  %s1632_s2 = inlined_call_operand.hbm [shape: f32[64,256], index: 2, kind: input, shape index: {}]   ;;  %s1633_s3 = inlined_call_operand.hbm [shape: f32[128,256], index: 3, kind: input, shape index: {}]   ;;  %s1634_s4 = inlined_call_operand.vmem [shape: f32[1,256], index: 4, kind: input, shape index: {}]   ;;  %s1635_s5 = inlined_call_operand.hbm [shape: f32[256,128], index: 5, kind: input, shape index: {}]   ;;  %s1636_s6 = inlined_call_operand.vmem [shape: f32[1,128], index: 6, kind: input, shape index: {}]   ;;  %s1637_s7 = inlined_call_operand.hbm [shape: f32[64,128], index: 7, kind: output, shape index: {}]  }
   0x1   :  { %1642 = sst [smem:[#allocation18_spill]] %s1630_s0 }
   0x2   :  { %1643 = sst [smem:[#allocation19_spill]] %s1632_s2 }
   0x3   :  { %1644 = sst [smem:[#allocation20_spill]] %s1633_s3 }
   0x4   :  { %1645 = sst [smem:[#allocation21_spill]] %s1635_s5 }
   0x5   :  { %12 = vsyncpa [#allocation3], 0 }
   0x6   :  { %14 = vsyncpa [#allocation3 + $0x1], 0 }
   0x7   :  { %15 = vsyncpa [#allocation6], 0 }
   0x8   :  { %17 = vsyncpa [#allocation6 + $0x1], 0 }
   0x9   :  { %18 = vsyncpa [#allocation9], 0 }
   0xa   :  { %19 = vsyncpa [#allocation4], 0 }
   0xb   :  { %21 = vsyncpa [#allocation4 + $0x1], 0  ;;  %s1377_s24 = smov 0   ;;  %s1379_s25 = smov 0  }
   0xc   :  { %s1381_s26 = smov 0   ;;  %s1383_s27 = smov 0  }
   0xd LB: > { %s1398_s28 = sadd.s32 4294967295, %s1326_s27   ;;  %s922_s29 = sadd.s32 4294967294, %s1326_s27   ;;  %s1326_s27 = sphi %s1383_s27, %s1664_s27   ;;  %s1322_s26 = sphi %s1381_s26, %s1663_s26   ;;  %s1318_s25 = sphi %s1379_s25, %s1662_s25   ;;  %s1314_s24 = sphi %s1377_s24, %s1661_s24  }
   0xe   : > { %p47_p0 = scmp.ne.s32.totalorder %s1318_s25, %s1314_s24  ;;  %p48_p1 = scmp.eq.s32.totalorder %s1398_s28, 0 }
   0xf   : > { %p202_p2 = scmp.eq.s32.totalorder %s1398_s28, 1  ;;  %p208_p3 = scmp.eq.s32.totalorder %s922_s29, 1 }
  0x10   : > { %p1407_p4 = por %p48_p1, %p47_p0  ;;  %p923_p5 = scmp.ge.s32.totalorder %s1326_s27, 1 }
  0x11   : > { %p1412_p6 = por %p208_p3, %p47_p0  ;;  %p215_p7 = scmp.lt.s32.totalorder %s1326_s27, 3 }
  0x12   : > { %s1648_s2 = sld [smem:[#allocation19_spill]]  ;;  %s1328_s13 = smov [#allocation7]  }
  0x13   : > { %p1420_p8 = pnand %p923_p5, %p215_p7  ;;  %s228_s14 = sshll.u32 %s1328_s13, 4  ;;  %s229_s14 = int_to_ptr.vmem [resolvable:$true] %s228_s14 }
  0x14   : > { %s1651_s3 = sld [smem:[#allocation20_spill]]  ;;  %s1329_s19 = smov 256  }
  0x15   : > { %p1011_p9 = pneg %p1420_p8  ;;  %s1330_s20 = smov 16  }
  0x16   : > { %s1331_s21 = smov [#allocation8]   ;;  %s1652_s5 = sld [smem:[#allocation21_spill]] }
  0x17   : > { %p1428_p10 = pnand %p1011_p9, %p48_p1  ;;  %s242_s22 = sshll.u32 %s1331_s21, 4  ;;  %s243_s22 = int_to_ptr.vmem [resolvable:$true] %s242_s22 }
  0x18   : > { %s226_s11 = sshll.u32 %s1648_s2, 4  ;;  %s1332_s10 = smov [#allocation10]   ;;  %s227_s11 = int_to_ptr.hbm [resolvable:$true] %s226_s11 }
  0x19   : > { %1014 = dma.hbm_to_vmem [thread:$0]  (!%p1428_p10), %s227_s11, 2048, %s229_s14, [#allocation6], %s1329_s19, %s1329_s19, %s1330_s20  }
  0x1a   : > { %s240_s18 = sshll.u32 %s1651_s3, 4  ;;  %s259_s13 = sshll.u32 %s1332_s10, 4  ;;  %s241_s18 = int_to_ptr.hbm [resolvable:$true] %s240_s18  ;;  %s260_s13 = int_to_ptr.vmem [resolvable:$true] %s259_s13 }
  0x1b   : > { %1017 = dma.hbm_to_vmem [thread:$0]  (!%p1428_p10), %s241_s18, 4096, %s243_s22, [#allocation9], %s1329_s19, %s1329_s19, %s1330_s20  }
  0x1c   : > { %s257_s9 = sshll.u32 %s1652_s5, 4  ;;  %s1638_s11 = smov 128   ;;  %s258_s9 = int_to_ptr.hbm [resolvable:$true] %s257_s9 }
  0x1d   : > { %s1640_s14 = smov 8   ;;  %s1449_s16 = sadd.s32 1, %s1326_s27  }
  0x1e   : > { %1020 = dma.hbm_to_vmem [thread:$0]  (!%p1428_p10), %s258_s9, 4096, %s260_s13, [#allocation9], %s1638_s11, %s1638_s11, %s1640_s14  }
  0x1f   : > { %s31_s17 = ssub.s32 %s1326_s27, %s1449_s16  ;;  %s34_s21 = sadd.s32 1, %s1322_s26 }
  0x20   : > { %p32_p12 = scmp.eq.s32.totalorder %s31_s17, 0  ;;  %p41_p13 = scmp.ne.s32.totalorder %s1322_s26, %s1318_s25 }
  0x21   : > { %p42_p0 = scmp.eq.s32.totalorder %s1326_s27, 0  ;;  %p1035_p3 = scmp.lt.s32.totalorder %s1326_s27, 2 }
  0x22   : > { %s1459_s18 = scalar_select %p32_p12, %s1322_s26, %s34_s21  }
  0x23   : > { %p43_p5 = por %p42_p0, %p41_p13  ;;  %p1463_p7 = por %p202_p2, %p41_p13 }
  0x24   : > { %1653 = sst [smem:[#allocation17_spill]] %s1459_s18  ;;  %s276_s19 = sand.u32 1, %s1322_s26  }
  0x25   : > { %s958_s20 = sshll.u32 %s1326_s27, 5  ;;  %s928_s22 = sshll.u32 %s276_s19, 5 }
  0x26   : > { %s1655_s0 = sld [smem:[#allocation18_spill]]  ;;  %s280_s13 = scalar_lea.vmem [#allocation2], %s928_s22 }
  0x27   : > { %s288_s17 = sshll.u32 %s280_s13, 4  ;;  %p1474_p9 = pnand %p1035_p3, %p43_p5  ;;  %s289_s17 = int_to_ptr.vmem [resolvable:$true] %s288_s17 }
  0x28   : > { %s307_s2 = scalar_lea.hbm %s1631_s1, %s958_s20  ;;  %s302_s3 = scalar_lea.vmem [#allocation5], %s928_s22 }
  0x29   : > { %s1481_s5 = sshll.u32 %s302_s3, 4  ;;  %s308_s23 = sshll.u32 %s307_s2, 4  ;;  %s309_s23 = int_to_ptr.hbm [resolvable:$true] %s308_s23  ;;  %s311_s5 = int_to_ptr.vmem [resolvable:$true] %s1481_s5 }
  0x2a   : > { %s277_s29 = scalar_lea.sflag [#allocation3], %s276_s19  ;;  %p1192_p10 = pneg %p1474_p9 }
  0x2c   : > { %s285_s9 = scalar_lea.hbm %s1655_s0, %s958_s20  ;;  %s1195_s14 = scalar_lea.hbm %s1655_s0, 64 }
  0x2d   : > { %s286_s10 = sshll.u32 %s285_s9, 4  ;;  %s287_s10 = int_to_ptr.hbm [resolvable:$true] %s286_s10 }
  0x2e   : > { %s1188_s9 = sshra.s32 %s287_s10, 4  ;;  %s1189_s9 = int_to_ptr.hbm [resolvable:$true] %s1188_s9 }
  0x2f   : > { %s1190_s13 = scalar_lea.hbm %s1189_s9, 32  ;;  %p1196_p0 = scmp.lt.s32.totalorder %s1189_s9, %s1655_s0 }
  0x30   : > { %p1191_p2 = scmp.ne.s32.totalorder %s1189_s9, %s1190_s13  ;;  %p1197_p3 = scmp.lt.s32.totalorder %s1195_s14, %s1190_s13 }
  0x32   : > { %p1193_p12 = pnand %p1192_p10, %p1191_p2  ;;  %p1198_p5 = por %p1197_p3, %p1196_p0 }
  0x34   : > { %p1194_p13 = pneg %p1193_p12 }
  0x36   : > { %p1199_p11 = pnand %p1198_p5, %p1194_p13 }
  0x38   : > { %1202 = shalt.err (!%p1199_p11)
}
  0x39   : > { %s1657_s2 = smov 8   ;;  %s1658_s3 = smov 128  }
  0x3a   : > { %1024 = dma.hbm_to_vmem [thread:$0]  (!%p1474_p9), %s287_s10, 512, %s289_s17, %s277_s29, %s1658_s3, %s1658_s3, %s1657_s2  }
  0x3b   : > { %s298_s18 = sand.u32 1, %s1326_s27   ;;  %s1218_s11 = sshra.s32 %s309_s23, 4  ;;  %s1219_s11 = int_to_ptr.hbm [resolvable:$true] %s1218_s11 }
  0x3c   : > { %s299_s19 = scalar_lea.sflag [#allocation6], %s298_s18  ;;  %s1220_s9 = scalar_lea.hbm %s1219_s11, 32 }
  0x3d   : > { %p1221_p2 = scmp.ne.s32.totalorder %s1219_s11, %s1220_s9  ;;  %s1225_s20 = scalar_lea.hbm %s1631_s1, 64 }
  0x3e   : > { %p1226_p13 = scmp.lt.s32.totalorder %s1219_s11, %s1631_s1  ;;  %p1227_p0 = scmp.lt.s32.totalorder %s1225_s20, %s1220_s9 }
  0x3f   : > { %p1223_p11 = pnand %p1221_p2, %p1192_p10 }
  0x40   : > { %p1228_p3 = por %p1227_p0, %p1226_p13 }
  0x41   : > { %p1224_p12 = pneg %p1223_p11 }
  0x43   : > { %p1229_p5 = pnand %p1228_p3, %p1224_p12 }
  0x45   : > { %1232 = shalt.err (!%p1229_p5)
}
  0x46   : > { %1027 = dma.hbm_to_vmem [thread:$0]  (!%p1474_p9), %s309_s23, 512, %s311_s5, %s299_s19, %s1658_s3, %s1658_s3, %s1657_s2  }
  0x47   : > { %322 = sbr.rel (%p1420_p8) target bundleno = 444 (0x1bc), region = 48  ;;  %s1518_s10 = sand.u32 (!%p1420_p8), 1, %s1318_s25  }
  0x48   : > { %s1521_s0 = sshll.u32 (!%p1420_p8), %s1518_s10, 5  ;;  %s325_s17 = scalar_lea.sflag (!%p1420_p8), [#allocation3], %s1518_s10 }
  0x49   : > { %s1525_s29 = scalar_lea.vmem (!%p1420_p8), [#allocation2], %s1521_s0 }
  0x4c   : > { %1293 = dma.done.wait (%p1407_p4), %s325_s17, 512  }
  0x4d   : > { %1295 = vsyncadd (%p1407_p4), %s325_s17, 4294966784  ;;  %s334_s5 = sand.u32 1, %s1398_s28   ;;  %s1533_s21 = scalar_lea.vmem [#allocation5], %s1521_s0 }
  0x4e   : > { %s335_s12 = scalar_lea.sflag [#allocation6], %s334_s5 }
  0x4f   : > { %1297 = dma.done.wait (%p1407_p4), %s335_s12, 512  }
  0x50   : > { %1299 = vsyncadd (%p1407_p4), %s335_s12, 4294966784 }
  0x51   : > { %1301 = dma.done.wait (%p48_p1), [#allocation6], 2048  }
  0x52   : > { %1303 = vsyncadd (%p48_p1), [#allocation6], 4294965248 }
  0x53   : > { %1305 = dma.done.wait (%p48_p1), [#allocation9], 8192  }
  0x54   : > { %1307 = vsyncadd (%p48_p1), [#allocation9], 4294959104  ;;  %v447_v0 = vld [vmem:[#allocation8 + $0xf0] sm:$0xff]  ;;  %v445_v1 = vld [vmem:[#allocation8 + $0xe0] sm:$0xff]  ;;  %vm507_vm0 = vcmask 523264   ;;  %s1587_s18 = scalar_lea.vmem [#allocation11], %s1521_s0 }
  0x55   : > { %v448_v2 = vld [vmem:[#allocation8 + $0xf8] sm:$0xff]  ;;  %449 = vmatpush.msra.mxu0 %v447_v0  ;;  %v446_v3 = vld [vmem:[#allocation8 + $0xe8] sm:$0xff]  ;;  %v443_v4 = vld [vmem:[#allocation8 + $0xd0] sm:$0xff]  ;;  %s960_s19 = sshll.u32 %s1398_s28, 5  ;;  %s795_s28 = sshll.u32 %s1587_s18, 4  ;;  %s796_s28 = int_to_ptr.vmem [resolvable:$true] %s795_s28 }
  0x56   : > { %478 = vmatpush.msra.mxu1 %v448_v2  ;;  %v444_v5 = vld [vmem:[#allocation8 + $0xd8] sm:$0xff]  ;;  %v415_v6 = vld [vmem:[#allocation7 + $0x70] sm:$0xff]  ;;  %v441_v7 = vld [vmem:[#allocation8 + $0xc0] sm:$0xff]  ;;  %s794_s13 = scalar_lea.hbm %s1637_s7, %s960_s19  ;;  %s783_s20 = scalar_lea.sflag [#allocation4], %s1518_s10 }
  0x57   : > { %450 = vmatpush.msra.mxu0 %v445_v1  ;;  %v442_v8 = vld [vmem:[#allocation8 + $0xc8] sm:$0xff]  ;;  %528 = vmatpush.msra.mxu2 %v415_v6  ;;  %v413_v9 = vld [vmem:[#allocation7 + $0x60] sm:$0xff]  ;;  %v439_v10 = vld [vmem:[#allocation8 + $0xb0] sm:$0xff]  ;;  %s797_s14 = sshll.u32 %s794_s13, 4  ;;  %s1268_s5 = scalar_lea.hbm %s1637_s7, 64  ;;  %s798_s14 = int_to_ptr.hbm [resolvable:$true] %s797_s14 }
  0x58   : > { %479 = vmatpush.msra.mxu1 %v446_v3  ;;  %v416_v11 = vld [vmem:[#allocation7 + $0x78] sm:$0xff]  ;;  %v411_v13 = vld [vmem:[#allocation7 + $0x50] sm:$0xff]  ;;  %v414_v14 = vld [vmem:[#allocation7 + $0x68] sm:$0xff]  ;;  %s1262_s22 = sshra.s32 %s798_s14, 4  ;;  %s1263_s22 = int_to_ptr.hbm [resolvable:$true] %s1262_s22 }
  0x59   : > { %451 = vmatpush.msra.mxu0 %v443_v4  ;;  %v440_v12 = vld [vmem:[#allocation8 + $0xb8] sm:$0xff]  ;;  %529 = vmatpush.msra.mxu2 %v413_v9  ;;  %v409_v15 = vld [vmem:[#allocation7 + $0x40] sm:$0xff]  ;;  %v438_v18 = vld [vmem:[#allocation8 + $0xa8] sm:$0xff]  ;;  %s1264_s0 = scalar_lea.hbm %s1263_s22, 32  ;;  %p1269_p9 = scmp.lt.s32.totalorder %s1263_s22, %s1637_s7 }
  0x5a   : > { %480 = vmatpush.msra.mxu1 %v444_v5  ;;  %557 = vmatpush.msra.mxu3 %v416_v11  ;;  %v412_v16 = vld [vmem:[#allocation7 + $0x58] sm:$0xff]  ;;  %v437_v17 = vld [vmem:[#allocation8 + $0xa0] sm:$0xff]  ;;  %v407_v19 = vld [vmem:[#allocation7 + $0x30] sm:$0xff]  ;;  %p1265_p1 = scmp.ne.s32.totalorder %s1263_s22, %s1264_s0  ;;  %p1270_p10 = scmp.lt.s32.totalorder %s1268_s5, %s1264_s0 }
  0x5b   : > { %452 = vmatpush.msra.mxu0 %v441_v7  ;;  %530 = vmatpush.msra.mxu2 %v411_v13  ;;  %v410_v20 = vld [vmem:[#allocation7 + $0x48] sm:$0xff]  ;;  %v435_v21 = vld [vmem:[#allocation8 + $0x90] sm:$0xff]  ;;  %v436_v22 = vld [vmem:[#allocation8 + $0x98] sm:$0xff] }
  0x5c   : > { %481 = vmatpush.msra.mxu1 %v442_v8  ;;  %558 = vmatpush.msra.mxu3 %v414_v14  ;;  %v405_v23 = vld [vmem:[#allocation7 + $0x20] sm:$0xff]  ;;  %v408_v24 = vld [vmem:[#allocation7 + $0x38] sm:$0xff]  ;;  %v434_v26 = vld [vmem:[#allocation8 + $0x88] sm:$0xff]  ;;  %p1266_p4 = pnand %p1265_p1, %p1463_p7  ;;  %p1271_p2 = por %p1270_p10, %p1269_p9 }
  0x5d   : > { %453 = vmatpush.msra.mxu0 %v439_v10  ;;  %531 = vmatpush.msra.mxu2 %v409_v15  ;;  %v433_v25 = vld [vmem:[#allocation8 + $0x80] sm:$0xff]  ;;  %v403_v27 = vld [vmem:[#allocation7 + $0x10] sm:$0xff]  ;;  %v406_v28 = vld [vmem:[#allocation7 + $0x28] sm:$0xff] }
  0x5e   : > { %482 = vmatpush.msra.mxu1 %v440_v12  ;;  %559 = vmatpush.msra.mxu3 %v412_v16  ;;  %v431_v29 = vld [vmem:[#allocation8 + $0x70] sm:$0xff]  ;;  %v432_v30 = vld [vmem:[#allocation8 + $0x78] sm:$0xff]  ;;  %v401_v31 = vld [vmem:[#allocation7] sm:$0xff]  ;;  %p1267_p8 = pneg %p1266_p4 }
  0x5f   : > { %454 = vmatpush.msra.mxu0 %v437_v17  ;;  %532 = vmatpush.msra.mxu2 %v407_v19  ;;  %v404_v32 = vld [vmem:[#allocation7 + $0x18] sm:$0xff]  ;;  %v429_v33 = vld [vmem:[#allocation8 + $0x60] sm:$0xff]  ;;  %v430_v34 = vld [vmem:[#allocation8 + $0x68] sm:$0xff] }
  0x60   : > { %483 = vmatpush.msra.mxu1 %v438_v18  ;;  %560 = vmatpush.msra.mxu3 %v410_v20  ;;  %v393_v35 = vld [vmem:[%s1525_s29] sm:$0xff]  ;;  %v402_v36 = vld [vmem:[#allocation7 + $0x8] sm:$0xff]  ;;  %v427_v37 = vld [vmem:[#allocation8 + $0x50] sm:$0xff]  ;;  %p1272_p11 = pnand %p1271_p2, %p1267_p8 }
  0x61   : > { %455 = vmatpush.msra.mxu0 %v435_v21  ;;  %533 = vmatpush.msra.mxu2 %v405_v23  ;;  %v428_v38 = vld [vmem:[#allocation8 + $0x58] sm:$0xff]  ;;  %v425_v39 = vld [vmem:[#allocation8 + $0x40] sm:$0xff]  ;;  %v426_v40 = vld [vmem:[#allocation8 + $0x48] sm:$0xff] }
  0x62   : > { %484 = vmatpush.msra.mxu1 %v436_v22  ;;  %561 = vmatpush.msra.mxu3 %v408_v24  ;;  %v423_v41 = vld [vmem:[#allocation8 + $0x30] sm:$0xff]  ;;  %v424_v42 = vld [vmem:[#allocation8 + $0x38] sm:$0xff]  ;;  %v421_v43 = vld [vmem:[#allocation8 + $0x20] sm:$0xff] }
  0x63   : > { %456 = vmatpush.msra.mxu0 %v433_v25  ;;  %534 = vmatpush.msra.mxu2 %v403_v27  ;;  %v422_v44 = vld [vmem:[#allocation8 + $0x28] sm:$0xff]  ;;  %v615_v46 = vld [vmem:[#allocation10 + $0x78] sm:$0xff]  ;;  %v419_v48 = vld [vmem:[#allocation8 + $0x10] sm:$0xff] }
  0x64   : > { %485 = vmatpush.msra.mxu1 %v434_v26  ;;  %562 = vmatpush.msra.mxu3 %v406_v28  ;;  %v394_v45 = vld [vmem:[%s1525_s29 + $0x8] sm:$0xff]  ;;  %v631_v47 = vld [vmem:[#allocation10 + $0xf8] sm:$0xff]  ;;  %v630_v50 = vld [vmem:[#allocation10 + $0xf0] sm:$0xff] }
  0x65   : > { %457 = vmatpush.msra.mxu0 %v431_v29  ;;  %535 = vmatpush.msra.mxu2 %v401_v31  ;;  %v420_v49 = vld [vmem:[#allocation8 + $0x18] sm:$0xff]  ;;  %v417_v51 = vld [vmem:[#allocation8] sm:$0xff]  ;;  %v418_v52 = vld [vmem:[#allocation8 + $0x8] sm:$0xff] }
  0x66   : > { %486 = vmatpush.msra.mxu1 %v432_v30  ;;  %563 = vmatpush.msra.mxu3 %v404_v32  ;;  %v1553_v53 = vld [vmem:[%s1533_s21] sm:$0xff]  ;;  %v614_v54 = vld [vmem:[#allocation10 + $0x70] sm:$0xff]  ;;  %v613_v56 = vld [vmem:[#allocation10 + $0x68] sm:$0xff] }
  0x67   : > { %458 = vmatpush.msra.mxu0 %v429_v33  ;;  %941 = vmatmul.msk.f32.vlgmr.msra.gmra.mxu2 %vm507_vm0, %v393_v35  ;;  %v395_v55 = vld [vmem:[%s1525_s29 + $0x10] sm:$0xff]  ;;  %v629_v57 = vld [vmem:[#allocation10 + $0xe8] sm:$0xff]  ;;  %v628_v58 = vld [vmem:[#allocation10 + $0xe0] sm:$0xff] }
  0x68   : > { %487 = vmatpush.msra.mxu1 %v430_v34  ;;  %564 = vmatpush.msra.mxu3 %v402_v36  ;;  %v612_v59 = vld [vmem:[#allocation10 + $0x60] sm:$0xff]  ;;  %v1561_v60 = vld [vmem:[%s1533_s21 + $0x8] sm:$0xff]  ;;  %v611_v61 = vld [vmem:[#allocation10 + $0x58] sm:$0xff] }
  0x69   : > { %459 = vmatpush.msra.mxu0 %v427_v37  ;;  %945 = vmatmul.msk.f32.vlgmr.msra.gmra.mxu3 %vm507_vm0, %v393_v35  ;;  %v627_v62 = vld [vmem:[#allocation10 + $0xd8] sm:$0xff]  ;;  %v610_v63 = vld [vmem:[#allocation10 + $0x50] sm:$0xff]  ;;  %v609_v2 = vld [vmem:[#allocation10 + $0x48] sm:$0xff] }
  0x6a   : > { %488 = vmatpush.msra.mxu1 %v428_v38  ;;  %961 = vmatpush.msrb.mxu2 %v615_v46  ;;  %v626_v0 = vld [vmem:[#allocation10 + $0xd0] sm:$0xff]  ;;  %v396_v1 = vld [vmem:[%s1525_s29 + $0x18] sm:$0xff]  ;;  %v625_v3 = vld [vmem:[#allocation10 + $0xc8] sm:$0xff] }
  0x6b   : > { %460 = vmatpush.msra.mxu0 %v425_v39  ;;  %977 = vmatpush.msrb.mxu3 %v631_v47  ;;  %v608_v4 = vld [vmem:[#allocation10 + $0x40] sm:$0xff]  ;;  %v1569_v6 = vld [vmem:[%s1533_s21 + $0x10] sm:$0xff]  ;;  %v607_v7 = vld [vmem:[#allocation10 + $0x38] sm:$0xff] }
  0x6c   : > { %489 = vmatpush.msra.mxu1 %v426_v40  ;;  %962 = vmatpush.msrb.mxu2 %v614_v54  ;;  %v624_v5 = vld [vmem:[#allocation10 + $0xc0] sm:$0xff]  ;;  %v623_v8 = vld [vmem:[#allocation10 + $0xb8] sm:$0xff]  ;;  %v606_v9 = vld [vmem:[#allocation10 + $0x30] sm:$0xff] }
  0x6d   : > { %461 = vmatpush.msra.mxu0 %v423_v41  ;;  %978 = vmatpush.msrb.mxu3 %v630_v50  ;;  %v622_v10 = vld [vmem:[#allocation10 + $0xb0] sm:$0xff]  ;;  %v605_v11 = vld [vmem:[#allocation10 + $0x28] sm:$0xff]  ;;  %v604_v13 = vld [vmem:[#allocation10 + $0x20] sm:$0xff] }
  0x6e   : > { %490 = vmatpush.msra.mxu1 %v424_v42  ;;  %963 = vmatpush.msrb.mxu2 %v613_v56  ;;  %v621_v12 = vld [vmem:[#allocation10 + $0xa8] sm:$0xff]  ;;  %v1575_v14 = vld [vmem:[%s1533_s21 + $0x18] sm:$0xff]  ;;  %v620_v16 = vld [vmem:[#allocation10 + $0xa0] sm:$0xff] }
  0x6f   : > { %462 = vmatpush.msra.mxu0 %v421_v43  ;;  %942 = vmatmul.msk.f32.gmra.mxu2 %vm507_vm0, %v394_v45  ;;  %v603_v15 = vld [vmem:[#allocation10 + $0x18] sm:$0xff]  ;;  %v602_v17 = vld [vmem:[#allocation10 + $0x10] sm:$0xff]  ;;  %v601_v19 = vld [vmem:[#allocation10 + $0x8] sm:$0xff] }
  0x70   : > { %491 = vmatpush.msra.mxu1 %v422_v44  ;;  %979 = vmatpush.msrb.mxu3 %v629_v57  ;;  %v619_v18 = vld [vmem:[#allocation10 + $0x98] sm:$0xff]  ;;  %v618_v20 = vld [vmem:[#allocation10 + $0x90] sm:$0xff]  ;;  %v600_v21 = vld [vmem:[#allocation10] sm:$0xff] }
  0x71   : > { %463 = vmatpush.msra.mxu0 %v419_v48  ;;  %946 = vmatmul.msk.f32.gmra.mxu3 %vm507_vm0, %v394_v45  ;;  %v617_v22 = vld [vmem:[#allocation10 + $0x88] sm:$0xff]  ;;  %v616_v23 = vld [vmem:[#allocation10 + $0x80] sm:$0xff] }
  0x72   : > { %492 = vmatpush.msra.mxu1 %v420_v49  ;;  %980 = vmatpush.msrb.mxu3 %v628_v58  ;;  %v578_v25 = vld [vmem:[%s1634_s4] sm:$0x3] }
  0x73   : > { %464 = vmatpush.msra.mxu0 %v417_v51  ;;  %964 = vmatpush.msrb.mxu2 %v612_v59  ;;  %v580_v27 = vperm.slane %v578_v25, 0  ;;  %v581_v28 = vperm.slane %v578_v25, 1 }
  0x74   : > { %493 = vmatpush.msra.mxu1 %v418_v52  ;;  %465 = vmatmul.f32.vlgmr.msra.gmra.mxu0 %v1553_v53 }
  0x75   : > { %494 = vmatmul.f32.vlgmr.msra.gmra.mxu1 %v1553_v53  ;;  %636 = vmatpush.msrb.mxu0 %v615_v46 }
  0x76   : > { %665 = vmatpush.msrb.mxu1 %v631_v47  ;;  %965 = vmatpush.msrb.mxu2 %v611_v61 }
  0x77   : > { %637 = vmatpush.msrb.mxu0 %v614_v54  ;;  %943 = vmatmul.msk.f32.gmra.mxu2 %vm507_vm0, %v395_v55 }
  0x78   : > { %666 = vmatpush.msrb.mxu1 %v630_v50  ;;  %981 = vmatpush.msrb.mxu3 %v627_v62 }
  0x79   : > { %638 = vmatpush.msrb.mxu0 %v613_v56  ;;  %947 = vmatmul.msk.f32.gmra.mxu3 %vm507_vm0, %v395_v55 }
  0x7a   : > { %667 = vmatpush.msrb.mxu1 %v629_v57  ;;  %982 = vmatpush.msrb.mxu3 %v626_v0 }
  0x7b   : > { %639 = vmatpush.msrb.mxu0 %v612_v59  ;;  %966 = vmatpush.msrb.mxu2 %v610_v63 }
  0x7c   : > { %668 = vmatpush.msrb.mxu1 %v628_v58  ;;  %468 = vmatmul.f32.gmra.mxu0 %v1561_v60 }
  0x7d   : > { %497 = vmatmul.f32.gmra.mxu1 %v1561_v60  ;;  %640 = vmatpush.msrb.mxu0 %v611_v61 }
  0x7e   : > { %669 = vmatpush.msrb.mxu1 %v627_v62  ;;  %967 = vmatpush.msrb.mxu2 %v609_v2 }
  0x7f   : > { %641 = vmatpush.msrb.mxu0 %v610_v63  ;;  %944 = vmatmul.msk.f32.gmra.mxu2 %vm507_vm0, %v396_v1 }
  0x80   : > { %670 = vmatpush.msrb.mxu1 %v626_v0  ;;  %983 = vmatpush.msrb.mxu3 %v625_v3 }
  0x81   : > { %642 = vmatpush.msrb.mxu0 %v609_v2  ;;  %948 = vmatmul.msk.f32.gmra.mxu3 %vm507_vm0, %v396_v1 }
  0x82   : > { %671 = vmatpush.msrb.mxu1 %v625_v3  ;;  %968 = vmatpush.msrb.mxu2 %v608_v4 }
  0x83   : > { %643 = vmatpush.msrb.mxu0 %v608_v4  ;;  %984 = vmatpush.msrb.mxu3 %v624_v5 }
  0x84   : > { %672 = vmatpush.msrb.mxu1 %v624_v5  ;;  %471 = vmatmul.f32.gmra.mxu0 %v1569_v6  ;;  %v1081_v5 = vld [vmem:[%s1636_s6] ss:$0 sm:$0xff] }
  0x85   : > { %500 = vmatmul.f32.gmra.mxu1 %v1569_v6  ;;  %644 = vmatpush.msrb.mxu0 %v607_v7 }
  0x86   : > { %673 = vmatpush.msrb.mxu1 %v623_v8  ;;  %969 = vmatpush.msrb.mxu2 %v607_v7 }
  0x87   : > { %645 = vmatpush.msrb.mxu0 %v606_v9  ;;  %985 = vmatpush.msrb.mxu3 %v623_v8 }
  0x88   : > { %674 = vmatpush.msrb.mxu1 %v622_v10  ;;  %970 = vmatpush.msrb.mxu2 %v606_v9 }
  0x89   : > { %646 = vmatpush.msrb.mxu0 %v605_v11  ;;  %986 = vmatpush.msrb.mxu3 %v622_v10 }
  0x8a   : > { %675 = vmatpush.msrb.mxu1 %v621_v12  ;;  %971 = vmatpush.msrb.mxu2 %v605_v11 }
  0x8b   : > { %647 = vmatpush.msrb.mxu0 %v604_v13  ;;  %987 = vmatpush.msrb.mxu3 %v621_v12 }
  0x8c   : > { %474 = vmatmul.f32.gmra.mxu0 %v1575_v14  ;;  %972 = vmatpush.msrb.mxu2 %v604_v13 }
  0x8d   : > { %503 = vmatmul.f32.gmra.mxu1 %v1575_v14  ;;  %648 = vmatpush.msrb.mxu0 %v603_v15 }
  0x8e   : > { %676 = vmatpush.msrb.mxu1 %v620_v16  ;;  %973 = vmatpush.msrb.mxu2 %v603_v15 }
  0x8f   : > { %988 = vmatpush.msrb.mxu3 %v620_v16  ;;  %649 = vmatpush.msrb.mxu0 %v602_v17 }
  0x90   : > { %677 = vmatpush.msrb.mxu1 %v619_v18  ;;  %974 = vmatpush.msrb.mxu2 %v602_v17 }
  0x91   : > { %989 = vmatpush.msrb.mxu3 %v619_v18  ;;  %650 = vmatpush.msrb.mxu0 %v601_v19 }
  0x92   : > { %678 = vmatpush.msrb.mxu1 %v618_v20  ;;  %975 = vmatpush.msrb.mxu2 %v601_v19 }
  0x93   : > { %990 = vmatpush.msrb.mxu3 %v618_v20  ;;  %651 = vmatpush.msrb.mxu0 %v600_v21 }
  0x94   : > { %679 = vmatpush.msrb.mxu1 %v617_v22  ;;  %976 = vmatpush.msrb.mxu2 %v600_v21 }
  0x95   : > { %991 = vmatpush.msrb.mxu3 %v617_v22 }
  0x96   : > { %680 = vmatpush.msrb.mxu1 %v616_v23 }
  0x97   : > { %992 = vmatpush.msrb.mxu3 %v616_v23 }
  0xea   : > { %v537_v24 = vpop.f32.mrf.mxu2 }
  0xec   : > { %v566_v26 = vpop.f32.mrf.mxu3 }
  0xf1   : > { %v466_v29 = vpop.f32.mrf.mxu0 }
  0xf2   : > { %v495_v30 = vpop.f32.mrf.mxu1  ;;  %v538_v31 = vadd.f32 %v537_v24, %v466_v29  ;;  %v540_v33 = vpop.f32.mrf.mxu2 }
  0xf3   : > { %v567_v32 = vadd.f32 %v566_v26, %v495_v30 }
  0xf4   : > { %v584_v34 = vadd.f32 %v580_v27, %v538_v31  ;;  %v569_v36 = vpop.f32.mrf.mxu3 }
  0xf5   : > { %v585_v35 = vadd.f32 %v581_v28, %v567_v32 }
  0xf6   : > { %v592_v37 = vmax.f32 %v584_v34, 0.0 }
  0xf7   : > { %v593_v38 = vmax.f32 %v585_v35, 0.0 }
  0xf8   : > { %652 = vmatmul.f32.vlgmr.msrb.gmra.mxu0 %v592_v37 }
  0xf9   : > { %681 = vmatmul.f32.vlgmr.msrb.gmra.mxu1 %v593_v38  ;;  %v469_v39 = vpop.f32.mrf.mxu0 }
  0xfa   : > { %v498_v40 = vpop.f32.mrf.mxu1  ;;  %v541_v41 = vadd.f32 %v540_v33, %v469_v39  ;;  %v543_v45 = vpop.f32.mrf.mxu2 }
  0xfb   : > { %v570_v42 = vadd.f32 %v569_v36, %v498_v40 }
  0xfc   : > { %v586_v43 = vadd.f32 %v580_v27, %v541_v41  ;;  %v572_v46 = vpop.f32.mrf.mxu3 }
  0xfd   : > { %v587_v44 = vadd.f32 %v581_v28, %v570_v42 }
  0xfe   : > { %v594_v47 = vmax.f32 %v586_v43, 0.0 }
  0xff   : > { %v595_v48 = vmax.f32 %v587_v44, 0.0 }
 0x100   : > { %655 = vmatmul.f32.vlgmr.msrb.gmra.mxu2 %v594_v47 }
 0x101   : > { %684 = vmatmul.f32.vlgmr.msrb.gmra.mxu3 %v595_v48  ;;  %v472_v49 = vpop.f32.mrf.mxu0 }
 0x102   : > { %v501_v50 = vpop.f32.mrf.mxu1  ;;  %v544_v51 = vadd.f32 %v543_v45, %v472_v49  ;;  %v546_v58 = vpop.f32.mrf.mxu2 }
 0x103   : > { %v573_v52 = vadd.f32 %v572_v46, %v501_v50 }
 0x104   : > { %v588_v54 = vadd.f32 %v580_v27, %v544_v51  ;;  %v575_v59 = vpop.f32.mrf.mxu3 }
 0x105   : > { %v589_v55 = vadd.f32 %v581_v28, %v573_v52 }
 0x106   : > { %v596_v56 = vmax.f32 %v588_v54, 0.0 }
 0x107   : > { %v597_v57 = vmax.f32 %v589_v55, 0.0 }
 0x108   : > { %658 = vmatmul.f32.gmra.mxu2 %v596_v56 }
 0x109   : > { %687 = vmatmul.f32.gmra.mxu3 %v597_v57  ;;  %v475_v61 = vpop.f32.mrf.mxu0 }
 0x10a   : > { %v504_v62 = vpop.f32.mrf.mxu1  ;;  %v547_v63 = vadd.f32 %v546_v58, %v475_v61 }
 0x10b   : > { %v576_v0 = vadd.f32 %v575_v59, %v504_v62 }
 0x10c   : > { %v590_v1 = vadd.f32 %v580_v27, %v547_v63 }
 0x10d   : > { %v591_v2 = vadd.f32 %v581_v28, %v576_v0 }
 0x10e   : > { %v598_v3 = vmax.f32 %v590_v1, 0.0 }
 0x10f   : > { %v599_v4 = vmax.f32 %v591_v2, 0.0 }
 0x110   : > { %661 = vmatmul.f32.gmra.mxu2 %v598_v3 }
 0x111   : > { %690 = vmatmul.f32.gmra.mxu3 %v599_v4 }
 0x175   : > { %v653_v7 = vpop.f32.mrf.mxu0 }
 0x176   : > { %v682_v8 = vpop.f32.mrf.mxu1  ;;  %v654_v9 = vadd.f32 %v1081_v5, %v653_v7 }
 0x178   : > { %v683_v10 = vadd.f32 %v682_v8, %v654_v9 }
 0x17a   : > { %v949_v11 = vmul.f32 -1.442695, %v683_v10 }
 0x17c   : > { %1082 = vpow2.f32 %v949_v11 }
 0x182   : > { %v1083_v12 = vpop.eup %1082 }
 0x183   : > { %v706_v13 = vadd.f32 1.0, %v1083_v12  ;;  %v656_v15 = vpop.f32.mrf.mxu2 }
 0x184   : > { %v685_v16 = vpop.f32.mrf.mxu3  ;;  %v657_v17 = vadd.f32 %v1081_v5, %v656_v15 }
 0x185   : > { %1084 = vrcp.f32 %v706_v13  ;;  %v721_v27 = vand.u32 2147483648, %v706_v13  ;;  %v719_v30 = vand.u32 2147483647, %v706_v13  ;;  %vm715_vm2 = vweird.f32 %v706_v13 }
 0x186   : > { %v686_v18 = vadd.f32 %v685_v16, %v657_v17 }
 0x187   : > { %v722_v34 = vor.u32 1.1754944e-38, %v721_v27  ;;  %vm720_vm4 = vcmp.eq.f32.partialorder %v719_v30, 8.507059e+37 }
 0x188   : > { %v950_v19 = vmul.f32 -1.442695, %v686_v18 }
 0x18a   : > { %1086 = vpow2.f32 %v950_v19 }
 0x18b   : > { %v1085_v20 = vpop.eup %1084  ;;  %v659_v21 = vpop.f32.mrf.mxu2 }
 0x18c   : > { %v688_v22 = vpop.f32.mrf.mxu3  ;;  %v711_v23 = vmul.f32 %v1085_v20, %v706_v13  ;;  %v660_v24 = vadd.f32 %v1081_v5, %v659_v21  ;;  %vm716_vm1 = vweird.f32 %v1085_v20 }
 0x18d   : > { %vm717_vm3 = vmor %vm715_vm2, %vm716_vm1 }
 0x18e   : > { %v712_v25 = vsub.f32 1.0, %v711_v23  ;;  %v689_v26 = vadd.f32 %v688_v22, %v660_v24 }
 0x190   : > { %v1087_v28 = vpop.eup %1086  ;;  %v713_v29 = vmul.f32 %v1085_v20, %v712_v25  ;;  %v951_v31 = vmul.f32 -1.442695, %v689_v26 }
 0x191   : > { %v707_v32 = vadd.f32 1.0, %v1087_v28 }
 0x192   : > { %v714_v33 = vadd.f32 %v1085_v20, %v713_v29  ;;  %1088 = vpow2.f32 %v951_v31 }
 0x193   : > { %1090 = vrcp.f32 %v707_v32  ;;  %v662_v35 = vpop.f32.mrf.mxu2  ;;  %v736_v49 = vand.u32 2147483648, %v707_v32  ;;  %v734_v51 = vand.u32 2147483647, %v707_v32  ;;  %vm730_vm6 = vweird.f32 %v707_v32 }
 0x194   : > { %v691_v36 = vpop.f32.mrf.mxu3  ;;  %v718_v37 = vsel %vm717_vm3, %v1085_v20, %v714_v33  ;;  %v663_v38 = vadd.f32 %v1081_v5, %v662_v35 }
 0x195   : > { %v723_v39 = vsel %vm720_vm4, %v722_v34, %v718_v37  ;;  %vm735_vm8 = vcmp.eq.f32.partialorder %v734_v51, 8.507059e+37 }
 0x196   : > { %v770_v40 = vmul.f32 2.0, %v723_v39  ;;  %v692_v41 = vadd.f32 %v691_v36, %v663_v38 }
 0x198   : > { %v1089_v42 = vpop.eup %1088  ;;  %v774_v43 = vmul.f32 %v770_v40, %v1553_v53  ;;  %v952_v44 = vmul.f32 -1.442695, %v692_v41  ;;  %v737_v53 = vor.u32 1.1754944e-38, %v736_v49 }
 0x199   : > { %v1091_v45 = vpop.eup %1090  ;;  %v708_v46 = vadd.f32 1.0, %v1089_v42 }
 0x19a   : > { %v726_v47 = vmul.f32 %v1091_v45, %v707_v32  ;;  %1092 = vpow2.f32 %v952_v44  ;;  %778 = vst [vmem:[%s1587_s18] sm:$0xff] %v774_v43  ;;  %vm731_vm5 = vweird.f32 %v1091_v45 }
 0x19b   : > { %1094 = vrcp.f32 %v708_v46  ;;  %vm732_vm7 = vmor %vm730_vm6, %vm731_vm5  ;;  %v751_v63 = vand.u32 2147483648, %v708_v46  ;;  %v749_v2 = vand.u32 2147483647, %v708_v46  ;;  %vm745_vm10 = vweird.f32 %v708_v46 }
 0x19c   : > { %v727_v48 = vsub.f32 1.0, %v726_v47 }
 0x19d   : > { %v752_v5 = vor.u32 1.1754944e-38, %v751_v63  ;;  %vm750_vm12 = vcmp.eq.f32.partialorder %v749_v2, 8.507059e+37 }
 0x19e   : > { %v728_v50 = vmul.f32 %v1091_v45, %v727_v48 }
 0x1a0   : > { %v1093_v52 = vpop.eup %1092  ;;  %v729_v54 = vadd.f32 %v1091_v45, %v728_v50 }
 0x1a1   : > { %v1095_v55 = vpop.eup %1094  ;;  %v709_v56 = vadd.f32 1.0, %v1093_v52 }
 0x1a2   : > { %v733_v57 = vsel %vm732_vm7, %v1091_v45, %v729_v54  ;;  %v741_v58 = vmul.f32 %v1095_v55, %v708_v46  ;;  %vm746_vm9 = vweird.f32 %v1095_v55 }
 0x1a3   : > { %v738_v59 = vsel %vm735_vm8, %v737_v53, %v733_v57  ;;  %1096 = vrcp.f32 %v709_v56  ;;  %vm747_vm11 = vmor %vm745_vm10, %vm746_vm9  ;;  %v764_v15 = vand.u32 2147483647, %v709_v56  ;;  %vm760_vm14 = vweird.f32 %v709_v56 }
 0x1a4   : > { %v771_v61 = vmul.f32 2.0, %v738_v59  ;;  %v742_v62 = vsub.f32 1.0, %v741_v58 }
 0x1a5   : > { %vm765_vm0 = vcmp.eq.f32.partialorder %v764_v15, 8.507059e+37 }
 0x1a6   : > { %v775_v0 = vmul.f32 %v771_v61, %v1561_v60  ;;  %v743_v1 = vmul.f32 %v1095_v55, %v742_v62  ;;  %v766_v60 = vand.u32 2147483648, %v709_v56 }
 0x1a8   : > { %v744_v3 = vadd.f32 %v1095_v55, %v743_v1  ;;  %779 = vst [vmem:[%s1587_s18 + $0x8] sm:$0xff] %v775_v0  ;;  %v767_v17 = vor.u32 1.1754944e-38, %v766_v60 }
 0x1a9   : > { %v1097_v4 = vpop.eup %1096 }
 0x1aa   : > { %v748_v7 = vsel %vm747_vm11, %v1095_v55, %v744_v3  ;;  %v756_v8 = vmul.f32 %v1097_v4, %v709_v56  ;;  %vm761_vm13 = vweird.f32 %v1097_v4 }
 0x1ab   : > { %v753_v9 = vsel %vm750_vm12, %v752_v5, %v748_v7  ;;  %vm762_vm15 = vmor %vm760_vm14, %vm761_vm13 }
 0x1ac   : > { %v772_v10 = vmul.f32 2.0, %v753_v9  ;;  %v757_v11 = vsub.f32 1.0, %v756_v8 }
 0x1ae   : > { %v776_v12 = vmul.f32 %v772_v10, %v1569_v6  ;;  %v758_v13 = vmul.f32 %v1097_v4, %v757_v11 }
 0x1b0   : > { %v759_v16 = vadd.f32 %v1097_v4, %v758_v13  ;;  %780 = vst [vmem:[%s1587_s18 + $0x10] sm:$0xff] %v776_v12 }
 0x1b2   : > { %v763_v18 = vsel %vm762_vm15, %v1097_v4, %v759_v16 }
 0x1b3   : > { %v768_v6 = vsel %vm765_vm0, %v767_v17, %v763_v18 }
 0x1b4   : > { %v773_v19 = vmul.f32 2.0, %v768_v6 }
 0x1b6   : > { %v777_v20 = vmul.f32 %v773_v19, %v1575_v14 }
 0x1b8   : > { %781 = vst [vmem:[%s1587_s18 + $0x18] sm:$0xff] %v777_v20 }
 0x1b9   : > { %1275 = shalt.err (!%p1272_p11)
}
 0x1ba   : > { %s1335_s10 = smov 128   ;;  %s1336_s30 = smov 8  }
 0x1bb   : > { %1009 = dma.vmem_to_hbm [thread:$0]  (%p1463_p7), %s796_s28, 512, %s798_s14, %s783_s20, %s1335_s10, %s1335_s10, %s1336_s30  }
 0x1bc PF: > { %s812_s23 = sand.u32 1, %s1314_s24   ;;  %p1659_p12 = scmp.ge.s32.totalorder %s1326_s27, 2 }
 0x1bd   : > { %s813_s2 = scalar_lea.sflag [#allocation4], %s812_s23 }
 0x1be   : > { %p1029_p13 = pnand %p1659_p12, %p1412_p6 }
 0x1c0   : > { %p1030_p0 = pneg %p1029_p13 }
 0x1c2   : > { %1309 = dma.done.wait (%p1030_p0), %s813_s2, 512  }
 0x1c3   : > { %1311 = vsyncadd (%p1030_p0), %s813_s2, 4294966784  ;;  %s1660_s3 = sld [smem:[#allocation17_spill]]  ;;  %p24_p3 = scmp.ge.s32.totalorder %s1449_s16, 4  }
 0x1c4   : > { %s1661_s24 = smov %s1318_s25  ;;  %s1662_s25 = smov %s1322_s26 }
 0x1c5   : > { %s1664_s27 = smov %s1449_s16  ;;  %26 = sbr.rel (!%p24_p3) target bundleno = 13 (0xd), region = 118 }
 0x1c9   : > { %s1663_s26 = smov %s1660_s3 }
 0x1ca   :  { %819 = vsyncpa [#allocation3], 1 }
 0x1cb   :  { %821 = vsyncpa [#allocation3 + $0x1], 1 }
 0x1cc   :  { %822 = vsyncpa [#allocation6], 1 }
 0x1cd   :  { %824 = vsyncpa [#allocation6 + $0x1], 1 }
 0x1ce   :  { %825 = vsyncpa [#allocation9], 1 }
 0x1cf   :  { %826 = vsyncpa [#allocation4], 1 }
 0x1d0   :  { %828 = vsyncpa [#allocation4 + $0x1], 1 }

// kernel: tpu_custom_call.1
= control target key start
LH: loop header
LB: loop body
LE: loop exit
PB: predicated region body
PF: predicated region fallthrough
CT: control target
= control target key end

     0   :  { %s1630_s0 = inlined_call_operand.hbm [shape: f32[64,64], index: 0, kind: input, shape index: {}]   ;;  %s1631_s1 = inlined_call_operand.hbm [shape: f32[64,128], index: 1, kind: input, shape index: {}]   ;;  %s1632_s2 = inlined_call_operand.hbm [shape: f32[64,256], index: 2, kind: input, shape index: {}]   ;;  %s1633_s3 = inlined_call_operand.hbm [shape: f32[128,256], index: 3, kind: input, shape index: {}]   ;;  %s1634_s4 = inlined_call_operand.vmem [shape: f32[1,256], index: 4, kind: input, shape index: {}]   ;;  %s1635_s5 = inlined_call_operand.hbm [shape: f32[256,128], index: 5, kind: input, shape index: {}]   ;;  %s1636_s6 = inlined_call_operand.vmem [shape: f32[1,128], index: 6, kind: input, shape index: {}]   ;;  %s1637_s7 = inlined_call_operand.hbm [shape: f32[64,128], index: 7, kind: output, shape index: {}]  }
   0x1   :  { %1642 = sst [smem:[#allocation18_spill]] %s1630_s0 }
   0x2   :  { %1643 = sst [smem:[#allocation19_spill]] %s1632_s2 }
   0x3   :  { %1644 = sst [smem:[#allocation20_spill]] %s1633_s3 }
   0x4   :  { %1645 = sst [smem:[#allocation21_spill]] %s1635_s5 }
   0x5   :  { %12 = vsyncpa [#allocation3], 0 }
   0x6   :  { %14 = vsyncpa [#allocation3 + $0x1], 0 }
   0x7   :  { %15 = vsyncpa [#allocation6], 0 }
   0x8   :  { %17 = vsyncpa [#allocation6 + $0x1], 0 }
   0x9   :  { %18 = vsyncpa [#allocation9], 0 }
   0xa   :  { %19 = vsyncpa [#allocation4], 0 }
   0xb   :  { %21 = vsyncpa [#allocation4 + $0x1], 0  ;;  %s1377_s24 = smov 0   ;;  %s1379_s25 = smov 0  }
   0xc   :  { %s1381_s26 = smov 0   ;;  %s1383_s27 = smov 0  }
   0xd LB: > { %s1398_s28 = sadd.s32 4294967295, %s1326_s27   ;;  %s922_s29 = sadd.s32 4294967294, %s1326_s27   ;;  %s1326_s27 = sphi %s1383_s27, %s1664_s27   ;;  %s1322_s26 = sphi %s1381_s26, %s1663_s26   ;;  %s1318_s25 = sphi %s1379_s25, %s1662_s25   ;;  %s1314_s24 = sphi %s1377_s24, %s1661_s24  }
   0xe   : > { %p47_p0 = scmp.ne.s32.totalorder %s1318_s25, %s1314_s24  ;;  %p48_p1 = scmp.eq.s32.totalorder %s1398_s28, 0 }
   0xf   : > { %p202_p2 = scmp.eq.s32.totalorder %s1398_s28, 1  ;;  %p208_p3 = scmp.eq.s32.totalorder %s922_s29, 1 }
  0x10   : > { %p1407_p4 = por %p48_p1, %p47_p0  ;;  %p923_p5 = scmp.ge.s32.totalorder %s1326_s27, 1 }
  0x11   : > { %p1412_p6 = por %p208_p3, %p47_p0  ;;  %p215_p7 = scmp.lt.s32.totalorder %s1326_s27, 3 }
  0x12   : > { %s1648_s2 = sld [smem:[#allocation19_spill]]  ;;  %s1328_s13 = smov [#allocation7]  }
  0x13   : > { %p1420_p8 = pnand %p923_p5, %p215_p7  ;;  %s228_s14 = sshll.u32 %s1328_s13, 4  ;;  %s229_s14 = int_to_ptr.vmem [resolvable:$true] %s228_s14 }
  0x14   : > { %s1651_s3 = sld [smem:[#allocation20_spill]]  ;;  %s1329_s19 = smov 256  }
  0x15   : > { %p1011_p9 = pneg %p1420_p8  ;;  %s1330_s20 = smov 16  }
  0x16   : > { %s1331_s21 = smov [#allocation8]   ;;  %s1652_s5 = sld [smem:[#allocation21_spill]] }
  0x17   : > { %p1428_p10 = pnand %p1011_p9, %p48_p1  ;;  %s242_s22 = sshll.u32 %s1331_s21, 4  ;;  %s243_s22 = int_to_ptr.vmem [resolvable:$true] %s242_s22 }
  0x18   : > { %s226_s11 = sshll.u32 %s1648_s2, 4  ;;  %s1332_s10 = smov [#allocation10]   ;;  %s227_s11 = int_to_ptr.hbm [resolvable:$true] %s226_s11 }
  0x19   : > { %1014 = dma.hbm_to_vmem [thread:$0]  (!%p1428_p10), %s227_s11, 2048, %s229_s14, [#allocation6], %s1329_s19, %s1329_s19, %s1330_s20  }
  0x1a   : > { %s240_s18 = sshll.u32 %s1651_s3, 4  ;;  %s259_s13 = sshll.u32 %s1332_s10, 4  ;;  %s241_s18 = int_to_ptr.hbm [resolvable:$true] %s240_s18  ;;  %s260_s13 = int_to_ptr.vmem [resolvable:$true] %s259_s13 }
  0x1b   : > { %1017 = dma.hbm_to_vmem [thread:$0]  (!%p1428_p10), %s241_s18, 4096, %s243_s22, [#allocation9], %s1329_s19, %s1329_s19, %s1330_s20  }
  0x1c   : > { %s257_s9 = sshll.u32 %s1652_s5, 4  ;;  %s1638_s11 = smov 128   ;;  %s258_s9 = int_to_ptr.hbm [resolvable:$true] %s257_s9 }
  0x1d   : > { %s1640_s14 = smov 8   ;;  %s1449_s16 = sadd.s32 1, %s1326_s27  }
  0x1e   : > { %1020 = dma.hbm_to_vmem [thread:$0]  (!%p1428_p10), %s258_s9, 4096, %s260_s13, [#allocation9], %s1638_s11, %s1638_s11, %s1640_s14  }
  0x1f   : > { %s31_s17 = ssub.s32 %s1326_s27, %s1449_s16  ;;  %s34_s21 = sadd.s32 1, %s1322_s26 }
  0x20   : > { %p32_p12 = scmp.eq.s32.totalorder %s31_s17, 0  ;;  %p41_p13 = scmp.ne.s32.totalorder %s1322_s26, %s1318_s25 }
  0x21   : > { %p42_p0 = scmp.eq.s32.totalorder %s1326_s27, 0  ;;  %p1035_p3 = scmp.lt.s32.totalorder %s1326_s27, 2 }
  0x22   : > { %s1459_s18 = scalar_select %p32_p12, %s1322_s26, %s34_s21  }
  0x23   : > { %p43_p5 = por %p42_p0, %p41_p13  ;;  %p1463_p7 = por %p202_p2, %p41_p13 }
  0x24   : > { %1653 = sst [smem:[#allocation17_spill]] %s1459_s18  ;;  %s276_s19 = sand.u32 1, %s1322_s26  }
  0x25   : > { %s958_s20 = sshll.u32 %s1326_s27, 5  ;;  %s928_s22 = sshll.u32 %s276_s19, 5 }
  0x26   : > { %s1655_s0 = sld [smem:[#allocation18_spill]]  ;;  %s280_s13 = scalar_lea.vmem [#allocation2], %s928_s22 }
  0x27   : > { %s288_s17 = sshll.u32 %s280_s13, 4  ;;  %p1474_p9 = pnand %p1035_p3, %p43_p5  ;;  %s289_s17 = int_to_ptr.vmem [resolvable:$true] %s288_s17 }
  0x28   : > { %s307_s2 = scalar_lea.hbm %s1631_s1, %s958_s20  ;;  %s302_s3 = scalar_lea.vmem [#allocation5], %s928_s22 }
  0x29   : > { %s1481_s5 = sshll.u32 %s302_s3, 4  ;;  %s308_s23 = sshll.u32 %s307_s2, 4  ;;  %s309_s23 = int_to_ptr.hbm [resolvable:$true] %s308_s23  ;;  %s311_s5 = int_to_ptr.vmem [resolvable:$true] %s1481_s5 }
  0x2a   : > { %s277_s29 = scalar_lea.sflag [#allocation3], %s276_s19  ;;  %p1192_p10 = pneg %p1474_p9 }
  0x2c   : > { %s285_s9 = scalar_lea.hbm %s1655_s0, %s958_s20  ;;  %s1195_s14 = scalar_lea.hbm %s1655_s0, 64 }
  0x2d   : > { %s286_s10 = sshll.u32 %s285_s9, 4  ;;  %s287_s10 = int_to_ptr.hbm [resolvable:$true] %s286_s10 }
  0x2e   : > { %s1188_s9 = sshra.s32 %s287_s10, 4  ;;  %s1189_s9 = int_to_ptr.hbm [resolvable:$true] %s1188_s9 }
  0x2f   : > { %s1190_s13 = scalar_lea.hbm %s1189_s9, 32  ;;  %p1196_p0 = scmp.lt.s32.totalorder %s1189_s9, %s1655_s0 }
  0x30   : > { %p1191_p2 = scmp.ne.s32.totalorder %s1189_s9, %s1190_s13  ;;  %p1197_p3 = scmp.lt.s32.totalorder %s1195_s14, %s1190_s13 }
  0x32   : > { %p1193_p12 = pnand %p1192_p10, %p1191_p2  ;;  %p1198_p5 = por %p1197_p3, %p1196_p0 }
  0x34   : > { %p1194_p13 = pneg %p1193_p12 }
  0x36   : > { %p1199_p11 = pnand %p1198_p5, %p1194_p13 }
  0x38   : > { %1202 = shalt.err (!%p1199_p11)
}
  0x39   : > { %s1657_s2 = smov 8   ;;  %s1658_s3 = smov 128  }
  0x3a   : > { %1024 = dma.hbm_to_vmem [thread:$0]  (!%p1474_p9), %s287_s10, 512, %s289_s17, %s277_s29, %s1658_s3, %s1658_s3, %s1657_s2  }
  0x3b   : > { %s298_s18 = sand.u32 1, %s1326_s27   ;;  %s1218_s11 = sshra.s32 %s309_s23, 4  ;;  %s1219_s11 = int_to_ptr.hbm [resolvable:$true] %s1218_s11 }
  0x3c   : > { %s299_s19 = scalar_lea.sflag [#allocation6], %s298_s18  ;;  %s1220_s9 = scalar_lea.hbm %s1219_s11, 32 }
  0x3d   : > { %p1221_p2 = scmp.ne.s32.totalorder %s1219_s11, %s1220_s9  ;;  %s1225_s20 = scalar_lea.hbm %s1631_s1, 64 }
  0x3e   : > { %p1226_p13 = scmp.lt.s32.totalorder %s1219_s11, %s1631_s1  ;;  %p1227_p0 = scmp.lt.s32.totalorder %s1225_s20, %s1220_s9 }
  0x3f   : > { %p1223_p11 = pnand %p1221_p2, %p1192_p10 }
  0x40   : > { %p1228_p3 = por %p1227_p0, %p1226_p13 }
  0x41   : > { %p1224_p12 = pneg %p1223_p11 }
  0x43   : > { %p1229_p5 = pnand %p1228_p3, %p1224_p12 }
  0x45   : > { %1232 = shalt.err (!%p1229_p5)
}
  0x46   : > { %1027 = dma.hbm_to_vmem [thread:$0]  (!%p1474_p9), %s309_s23, 512, %s311_s5, %s299_s19, %s1658_s3, %s1658_s3, %s1657_s2  }
  0x47   : > { %322 = sbr.rel (%p1420_p8) target bundleno = 444 (0x1bc), region = 48  ;;  %s1518_s10 = sand.u32 (!%p1420_p8), 1, %s1318_s25  }
  0x48   : > { %s1521_s0 = sshll.u32 (!%p1420_p8), %s1518_s10, 5  ;;  %s325_s17 = scalar_lea.sflag (!%p1420_p8), [#allocation3], %s1518_s10 }
  0x49   : > { %s1525_s29 = scalar_lea.vmem (!%p1420_p8), [#allocation2], %s1521_s0 }
  0x4c   : > { %1293 = dma.done.wait (%p1407_p4), %s325_s17, 512  }
  0x4d   : > { %1295 = vsyncadd (%p1407_p4), %s325_s17, 4294966784  ;;  %s334_s5 = sand.u32 1, %s1398_s28   ;;  %s1533_s21 = scalar_lea.vmem [#allocation5], %s1521_s0 }
  0x4e   : > { %s335_s12 = scalar_lea.sflag [#allocation6], %s334_s5 }
  0x4f   : > { %1297 = dma.done.wait (%p1407_p4), %s335_s12, 512  }
  0x50   : > { %1299 = vsyncadd (%p1407_p4), %s335_s12, 4294966784 }
  0x51   : > { %1301 = dma.done.wait (%p48_p1), [#allocation6], 2048  }
  0x52   : > { %1303 = vsyncadd (%p48_p1), [#allocation6], 4294965248 }
  0x53   : > { %1305 = dma.done.wait (%p48_p1), [#allocation9], 8192  }
  0x54   : > { %1307 = vsyncadd (%p48_p1), [#allocation9], 4294959104  ;;  %v447_v0 = vld [vmem:[#allocation8 + $0xf0] sm:$0xff]  ;;  %v445_v1 = vld [vmem:[#allocation8 + $0xe0] sm:$0xff]  ;;  %vm507_vm0 = vcmask 523264   ;;  %s1587_s18 = scalar_lea.vmem [#allocation11], %s1521_s0 }
  0x55   : > { %v448_v2 = vld [vmem:[#allocation8 + $0xf8] sm:$0xff]  ;;  %449 = vmatpush.msra.mxu0 %v447_v0  ;;  %v446_v3 = vld [vmem:[#allocation8 + $0xe8] sm:$0xff]  ;;  %v443_v4 = vld [vmem:[#allocation8 + $0xd0] sm:$0xff]  ;;  %s960_s19 = sshll.u32 %s1398_s28, 5  ;;  %s795_s28 = sshll.u32 %s1587_s18, 4  ;;  %s796_s28 = int_to_ptr.vmem [resolvable:$true] %s795_s28 }
  0x56   : > { %478 = vmatpush.msra.mxu1 %v448_v2  ;;  %v444_v5 = vld [vmem:[#allocation8 + $0xd8] sm:$0xff]  ;;  %v415_v6 = vld [vmem:[#allocation7 + $0x70] sm:$0xff]  ;;  %v441_v7 = vld [vmem:[#allocation8 + $0xc0] sm:$0xff]  ;;  %s794_s13 = scalar_lea.hbm %s1637_s7, %s960_s19  ;;  %s783_s20 = scalar_lea.sflag [#allocation4], %s1518_s10 }
  0x57   : > { %450 = vmatpush.msra.mxu0 %v445_v1  ;;  %v442_v8 = vld [vmem:[#allocation8 + $0xc8] sm:$0xff]  ;;  %528 = vmatpush.msra.mxu2 %v415_v6  ;;  %v413_v9 = vld [vmem:[#allocation7 + $0x60] sm:$0xff]  ;;  %v439_v10 = vld [vmem:[#allocation8 + $0xb0] sm:$0xff]  ;;  %s797_s14 = sshll.u32 %s794_s13, 4  ;;  %s1268_s5 = scalar_lea.hbm %s1637_s7, 64  ;;  %s798_s14 = int_to_ptr.hbm [resolvable:$true] %s797_s14 }
  0x58   : > { %479 = vmatpush.msra.mxu1 %v446_v3  ;;  %v416_v11 = vld [vmem:[#allocation7 + $0x78] sm:$0xff]  ;;  %v411_v13 = vld [vmem:[#allocation7 + $0x50] sm:$0xff]  ;;  %v414_v14 = vld [vmem:[#allocation7 + $0x68] sm:$0xff]  ;;  %s1262_s22 = sshra.s32 %s798_s14, 4  ;;  %s1263_s22 = int_to_ptr.hbm [resolvable:$true] %s1262_s22 }
  0x59   : > { %451 = vmatpush.msra.mxu0 %v443_v4  ;;  %v440_v12 = vld [vmem:[#allocation8 + $0xb8] sm:$0xff]  ;;  %529 = vmatpush.msra.mxu2 %v413_v9  ;;  %v409_v15 = vld [vmem:[#allocation7 + $0x40] sm:$0xff]  ;;  %v438_v18 = vld [vmem:[#allocation8 + $0xa8] sm:$0xff]  ;;  %s1264_s0 = scalar_lea.hbm %s1263_s22, 32  ;;  %p1269_p9 = scmp.lt.s32.totalorder %s1263_s22, %s1637_s7 }
  0x5a   : > { %480 = vmatpush.msra.mxu1 %v444_v5  ;;  %557 = vmatpush.msra.mxu3 %v416_v11  ;;  %v412_v16 = vld [vmem:[#allocation7 + $0x58] sm:$0xff]  ;;  %v437_v17 = vld [vmem:[#allocation8 + $0xa0] sm:$0xff]  ;;  %v407_v19 = vld [vmem:[#allocation7 + $0x30] sm:$0xff]  ;;  %p1265_p1 = scmp.ne.s32.totalorder %s1263_s22, %s1264_s0  ;;  %p1270_p10 = scmp.lt.s32.totalorder %s1268_s5, %s1264_s0 }
  0x5b   : > { %452 = vmatpush.msra.mxu0 %v441_v7  ;;  %530 = vmatpush.msra.mxu2 %v411_v13  ;;  %v410_v20 = vld [vmem:[#allocation7 + $0x48] sm:$0xff]  ;;  %v435_v21 = vld [vmem:[#allocation8 + $0x90] sm:$0xff]  ;;  %v436_v22 = vld [vmem:[#allocation8 + $0x98] sm:$0xff] }
  0x5c   : > { %481 = vmatpush.msra.mxu1 %v442_v8  ;;  %558 = vmatpush.msra.mxu3 %v414_v14  ;;  %v405_v23 = vld [vmem:[#allocation7 + $0x20] sm:$0xff]  ;;  %v408_v24 = vld [vmem:[#allocation7 + $0x38] sm:$0xff]  ;;  %v434_v26 = vld [vmem:[#allocation8 + $0x88] sm:$0xff]  ;;  %p1266_p4 = pnand %p1265_p1, %p1463_p7  ;;  %p1271_p2 = por %p1270_p10, %p1269_p9 }
  0x5d   : > { %453 = vmatpush.msra.mxu0 %v439_v10  ;;  %531 = vmatpush.msra.mxu2 %v409_v15  ;;  %v433_v25 = vld [vmem:[#allocation8 + $0x80] sm:$0xff]  ;;  %v403_v27 = vld [vmem:[#allocation7 + $0x10] sm:$0xff]  ;;  %v406_v28 = vld [vmem:[#allocation7 + $0x28] sm:$0xff] }
  0x5e   : > { %482 = vmatpush.msra.mxu1 %v440_v12  ;;  %559 = vmatpush.msra.mxu3 %v412_v16  ;;  %v431_v29 = vld [vmem:[#allocation8 + $0x70] sm:$0xff]  ;;  %v432_v30 = vld [vmem:[#allocation8 + $0x78] sm:$0xff]  ;;  %v401_v31 = vld [vmem:[#allocation7] sm:$0xff]  ;;  %p1267_p8 = pneg %p1266_p4 }
  0x5f   : > { %454 = vmatpush.msra.mxu0 %v437_v17  ;;  %532 = vmatpush.msra.mxu2 %v407_v19  ;;  %v404_v32 = vld [vmem:[#allocation7 + $0x18] sm:$0xff]  ;;  %v429_v33 = vld [vmem:[#allocation8 + $0x60] sm:$0xff]  ;;  %v430_v34 = vld [vmem:[#allocation8 + $0x68] sm:$0xff] }
  0x60   : > { %483 = vmatpush.msra.mxu1 %v438_v18  ;;  %560 = vmatpush.msra.mxu3 %v410_v20  ;;  %v393_v35 = vld [vmem:[%s1525_s29] sm:$0xff]  ;;  %v402_v36 = vld [vmem:[#allocation7 + $0x8] sm:$0xff]  ;;  %v427_v37 = vld [vmem:[#allocation8 + $0x50] sm:$0xff]  ;;  %p1272_p11 = pnand %p1271_p2, %p1267_p8 }
  0x61   : > { %455 = vmatpush.msra.mxu0 %v435_v21  ;;  %533 = vmatpush.msra.mxu2 %v405_v23  ;;  %v428_v38 = vld [vmem:[#allocation8 + $0x58] sm:$0xff]  ;;  %v425_v39 = vld [vmem:[#allocation8 + $0x40] sm:$0xff]  ;;  %v426_v40 = vld [vmem:[#allocation8 + $0x48] sm:$0xff] }
  0x62   : > { %484 = vmatpush.msra.mxu1 %v436_v22  ;;  %561 = vmatpush.msra.mxu3 %v408_v24  ;;  %v423_v41 = vld [vmem:[#allocation8 + $0x30] sm:$0xff]  ;;  %v424_v42 = vld [vmem:[#allocation8 + $0x38] sm:$0xff]  ;;  %v421_v43 = vld [vmem:[#allocation8 + $0x20] sm:$0xff] }
  0x63   : > { %456 = vmatpush.msra.mxu0 %v433_v25  ;;  %534 = vmatpush.msra.mxu2 %v403_v27  ;;  %v422_v44 = vld [vmem:[#allocation8 + $0x28] sm:$0xff]  ;;  %v615_v46 = vld [vmem:[#allocation10 + $0x78] sm:$0xff]  ;;  %v419_v48 = vld [vmem:[#allocation8 + $0x10] sm:$0xff] }
  0x64   : > { %485 = vmatpush.msra.mxu1 %v434_v26  ;;  %562 = vmatpush.msra.mxu3 %v406_v28  ;;  %v394_v45 = vld [vmem:[%s1525_s29 + $0x8] sm:$0xff]  ;;  %v631_v47 = vld [vmem:[#allocation10 + $0xf8] sm:$0xff]  ;;  %v630_v50 = vld [vmem:[#allocation10 + $0xf0] sm:$0xff] }
  0x65   : > { %457 = vmatpush.msra.mxu0 %v431_v29  ;;  %535 = vmatpush.msra.mxu2 %v401_v31  ;;  %v420_v49 = vld [vmem:[#allocation8 + $0x18] sm:$0xff]  ;;  %v417_v51 = vld [vmem:[#allocation8] sm:$0xff]  ;;  %v418_v52 = vld [vmem:[#allocation8 + $0x8] sm:$0xff] }
  0x66   : > { %486 = vmatpush.msra.mxu1 %v432_v30  ;;  %563 = vmatpush.msra.mxu3 %v404_v32  ;;  %v1553_v53 = vld [vmem:[%s1533_s21] sm:$0xff]  ;;  %v614_v54 = vld [vmem:[#allocation10 + $0x70] sm:$0xff]  ;;  %v613_v56 = vld [vmem:[#allocation10 + $0x68] sm:$0xff] }
  0x67   : > { %458 = vmatpush.msra.mxu0 %v429_v33  ;;  %941 = vmatmul.msk.f32.vlgmr.msra.gmra.mxu2 %vm507_vm0, %v393_v35  ;;  %v395_v55 = vld [vmem:[%s1525_s29 + $0x10] sm:$0xff]  ;;  %v629_v57 = vld [vmem:[#allocation10 + $0xe8] sm:$0xff]  ;;  %v628_v58 = vld [vmem:[#allocation10 + $0xe0] sm:$0xff] }
  0x68   : > { %487 = vmatpush.msra.mxu1 %v430_v34  ;;  %564 = vmatpush.msra.mxu3 %v402_v36  ;;  %v612_v59 = vld [vmem:[#allocation10 + $0x60] sm:$0xff]  ;;  %v1561_v60 = vld [vmem:[%s1533_s21 + $0x8] sm:$0xff]  ;;  %v611_v61 = vld [vmem:[#allocation10 + $0x58] sm:$0xff] }
  0x69   : > { %459 = vmatpush.msra.mxu0 %v427_v37  ;;  %945 = vmatmul.msk.f32.vlgmr.msra.gmra.mxu3 %vm507_vm0, %v393_v35  ;;  %v627_v62 = vld [vmem:[#allocation10 + $0xd8] sm:$0xff]  ;;  %v610_v63 = vld [vmem:[#allocation10 + $0x50] sm:$0xff]  ;;  %v609_v2 = vld [vmem:[#allocation10 + $0x48] sm:$0xff] }
  0x6a   : > { %488 = vmatpush.msra.mxu1 %v428_v38  ;;  %961 = vmatpush.msrb.mxu2 %v615_v46  ;;  %v626_v0 = vld [vmem:[#allocation10 + $0xd0] sm:$0xff]  ;;  %v396_v1 = vld [vmem:[%s1525_s29 + $0x18] sm:$0xff]  ;;  %v625_v3 = vld [vmem:[#allocation10 + $0xc8] sm:$0xff] }
  0x6b   : > { %460 = vmatpush.msra.mxu0 %v425_v39  ;;  %977 = vmatpush.msrb.mxu3 %v631_v47  ;;  %v608_v4 = vld [vmem:[#allocation10 + $0x40] sm:$0xff]  ;;  %v1569_v6 = vld [vmem:[%s1533_s21 + $0x10] sm:$0xff]  ;;  %v607_v7 = vld [vmem:[#allocation10 + $0x38] sm:$0xff] }
  0x6c   : > { %489 = vmatpush.msra.mxu1 %v426_v40  ;;  %962 = vmatpush.msrb.mxu2 %v614_v54  ;;  %v624_v5 = vld [vmem:[#allocation10 + $0xc0] sm:$0xff]  ;;  %v623_v8 = vld [vmem:[#allocation10 + $0xb8] sm:$0xff]  ;;  %v606_v9 = vld [vmem:[#allocation10 + $0x30] sm:$0xff] }
  0x6d   : > { %461 = vmatpush.msra.mxu0 %v423_v41  ;;  %978 = vmatpush.msrb.mxu3 %v630_v50  ;;  %v622_v10 = vld [vmem:[#allocation10 + $0xb0] sm:$0xff]  ;;  %v605_v11 = vld [vmem:[#allocation10 + $0x28] sm:$0xff]  ;;  %v604_v13 = vld [vmem:[#allocation10 + $0x20] sm:$0xff] }
  0x6e   : > { %490 = vmatpush.msra.mxu1 %v424_v42  ;;  %963 = vmatpush.msrb.mxu2 %v613_v56  ;;  %v621_v12 = vld [vmem:[#allocation10 + $0xa8] sm:$0xff]  ;;  %v1575_v14 = vld [vmem:[%s1533_s21 + $0x18] sm:$0xff]  ;;  %v620_v16 = vld [vmem:[#allocation10 + $0xa0] sm:$0xff] }
  0x6f   : > { %462 = vmatpush.msra.mxu0 %v421_v43  ;;  %942 = vmatmul.msk.f32.gmra.mxu2 %vm507_vm0, %v394_v45  ;;  %v603_v15 = vld [vmem:[#allocation10 + $0x18] sm:$0xff]  ;;  %v602_v17 = vld [vmem:[#allocation10 + $0x10] sm:$0xff]  ;;  %v601_v19 = vld [vmem:[#allocation10 + $0x8] sm:$0xff] }
  0x70   : > { %491 = vmatpush.msra.mxu1 %v422_v44  ;;  %979 = vmatpush.msrb.mxu3 %v629_v57  ;;  %v619_v18 = vld [vmem:[#allocation10 + $0x98] sm:$0xff]  ;;  %v618_v20 = vld [vmem:[#allocation10 + $0x90] sm:$0xff]  ;;  %v600_v21 = vld [vmem:[#allocation10] sm:$0xff] }
  0x71   : > { %463 = vmatpush.msra.mxu0 %v419_v48  ;;  %946 = vmatmul.msk.f32.gmra.mxu3 %vm507_vm0, %v394_v45  ;;  %v617_v22 = vld [vmem:[#allocation10 + $0x88] sm:$0xff]  ;;  %v616_v23 = vld [vmem:[#allocation10 + $0x80] sm:$0xff] }
  0x72   : > { %492 = vmatpush.msra.mxu1 %v420_v49  ;;  %980 = vmatpush.msrb.mxu3 %v628_v58  ;;  %v578_v25 = vld [vmem:[%s1634_s4] sm:$0x3] }
  0x73   : > { %464 = vmatpush.msra.mxu0 %v417_v51  ;;  %964 = vmatpush.msrb.mxu2 %v612_v59  ;;  %v580_v27 = vperm.slane %v578_v25, 0  ;;  %v581_v28 = vperm.slane %v578_v25, 1 }
  0x74   : > { %493 = vmatpush.msra.mxu1 %v418_v52  ;;  %465 = vmatmul.f32.vlgmr.msra.gmra.mxu0 %v1553_v53 }
  0x75   : > { %494 = vmatmul.f32.vlgmr.msra.gmra.mxu1 %v1553_v53  ;;  %636 = vmatpush.msrb.mxu0 %v615_v46 }
  0x76   : > { %665 = vmatpush.msrb.mxu1 %v631_v47  ;;  %965 = vmatpush.msrb.mxu2 %v611_v61 }
  0x77   : > { %637 = vmatpush.msrb.mxu0 %v614_v54  ;;  %943 = vmatmul.msk.f32.gmra.mxu2 %vm507_vm0, %v395_v55 }
  0x78   : > { %666 = vmatpush.msrb.mxu1 %v630_v50  ;;  %981 = vmatpush.msrb.mxu3 %v627_v62 }
  0x79   : > { %638 = vmatpush.msrb.mxu0 %v613_v56  ;;  %947 = vmatmul.msk.f32.gmra.mxu3 %vm507_vm0, %v395_v55 }
  0x7a   : > { %667 = vmatpush.msrb.mxu1 %v629_v57  ;;  %982 = vmatpush.msrb.mxu3 %v626_v0 }
  0x7b   : > { %639 = vmatpush.msrb.mxu0 %v612_v59  ;;  %966 = vmatpush.msrb.mxu2 %v610_v63 }
  0x7c   : > { %668 = vmatpush.msrb.mxu1 %v628_v58  ;;  %468 = vmatmul.f32.gmra.mxu0 %v1561_v60 }
  0x7d   : > { %497 = vmatmul.f32.gmra.mxu1 %v1561_v60  ;;  %640 = vmatpush.msrb.mxu0 %v611_v61 }
  0x7e   : > { %669 = vmatpush.msrb.mxu1 %v627_v62  ;;  %967 = vmatpush.msrb.mxu2 %v609_v2 }
  0x7f   : > { %641 = vmatpush.msrb.mxu0 %v610_v63  ;;  %944 = vmatmul.msk.f32.gmra.mxu2 %vm507_vm0, %v396_v1 }
  0x80   : > { %670 = vmatpush.msrb.mxu1 %v626_v0  ;;  %983 = vmatpush.msrb.mxu3 %v625_v3 }
  0x81   : > { %642 = vmatpush.msrb.mxu0 %v609_v2  ;;  %948 = vmatmul.msk.f32.gmra.mxu3 %vm507_vm0, %v396_v1 }
  0x82   : > { %671 = vmatpush.msrb.mxu1 %v625_v3  ;;  %968 = vmatpush.msrb.mxu2 %v608_v4 }
  0x83   : > { %643 = vmatpush.msrb.mxu0 %v608_v4  ;;  %984 = vmatpush.msrb.mxu3 %v624_v5 }
  0x84   : > { %672 = vmatpush.msrb.mxu1 %v624_v5  ;;  %471 = vmatmul.f32.gmra.mxu0 %v1569_v6  ;;  %v1081_v5 = vld [vmem:[%s1636_s6] ss:$0 sm:$0xff] }
  0x85   : > { %500 = vmatmul.f32.gmra.mxu1 %v1569_v6  ;;  %644 = vmatpush.msrb.mxu0 %v607_v7 }
  0x86   : > { %673 = vmatpush.msrb.mxu1 %v623_v8  ;;  %969 = vmatpush.msrb.mxu2 %v607_v7 }
  0x87   : > { %645 = vmatpush.msrb.mxu0 %v606_v9  ;;  %985 = vmatpush.msrb.mxu3 %v623_v8 }
  0x88   : > { %674 = vmatpush.msrb.mxu1 %v622_v10  ;;  %970 = vmatpush.msrb.mxu2 %v606_v9 }
  0x89   : > { %646 = vmatpush.msrb.mxu0 %v605_v11  ;;  %986 = vmatpush.msrb.mxu3 %v622_v10 }
  0x8a   : > { %675 = vmatpush.msrb.mxu1 %v621_v12  ;;  %971 = vmatpush.msrb.mxu2 %v605_v11 }
  0x8b   : > { %647 = vmatpush.msrb.mxu0 %v604_v13  ;;  %987 = vmatpush.msrb.mxu3 %v621_v12 }
  0x8c   : > { %474 = vmatmul.f32.gmra.mxu0 %v1575_v14  ;;  %972 = vmatpush.msrb.mxu2 %v604_v13 }
  0x8d   : > { %503 = vmatmul.f32.gmra.mxu1 %v1575_v14  ;;  %648 = vmatpush.msrb.mxu0 %v603_v15 }
  0x8e   : > { %676 = vmatpush.msrb.mxu1 %v620_v16  ;;  %973 = vmatpush.msrb.mxu2 %v603_v15 }
  0x8f   : > { %988 = vmatpush.msrb.mxu3 %v620_v16  ;;  %649 = vmatpush.msrb.mxu0 %v602_v17 }
  0x90   : > { %677 = vmatpush.msrb.mxu1 %v619_v18  ;;  %974 = vmatpush.msrb.mxu2 %v602_v17 }
  0x91   : > { %989 = vmatpush.msrb.mxu3 %v619_v18  ;;  %650 = vmatpush.msrb.mxu0 %v601_v19 }
  0x92   : > { %678 = vmatpush.msrb.mxu1 %v618_v20  ;;  %975 = vmatpush.msrb.mxu2 %v601_v19 }
  0x93   : > { %990 = vmatpush.msrb.mxu3 %v618_v20  ;;  %651 = vmatpush.msrb.mxu0 %v600_v21 }
  0x94   : > { %679 = vmatpush.msrb.mxu1 %v617_v22  ;;  %976 = vmatpush.msrb.mxu2 %v600_v21 }
  0x95   : > { %991 = vmatpush.msrb.mxu3 %v617_v22 }
  0x96   : > { %680 = vmatpush.msrb.mxu1 %v616_v23 }
  0x97   : > { %992 = vmatpush.msrb.mxu3 %v616_v23 }
  0xea   : > { %v537_v24 = vpop.f32.mrf.mxu2 }
  0xec   : > { %v566_v26 = vpop.f32.mrf.mxu3 }
  0xf1   : > { %v466_v29 = vpop.f32.mrf.mxu0 }
  0xf2   : > { %v495_v30 = vpop.f32.mrf.mxu1  ;;  %v538_v31 = vadd.f32 %v537_v24, %v466_v29  ;;  %v540_v33 = vpop.f32.mrf.mxu2 }
  0xf3   : > { %v567_v32 = vadd.f32 %v566_v26, %v495_v30 }
  0xf4   : > { %v584_v34 = vadd.f32 %v580_v27, %v538_v31  ;;  %v569_v36 = vpop.f32.mrf.mxu3 }
  0xf5   : > { %v585_v35 = vadd.f32 %v581_v28, %v567_v32 }
  0xf6   : > { %v592_v37 = vmax.f32 %v584_v34, 0.0 }
  0xf7   : > { %v593_v38 = vmax.f32 %v585_v35, 0.0 }
  0xf8   : > { %652 = vmatmul.f32.vlgmr.msrb.gmra.mxu0 %v592_v37 }
  0xf9   : > { %681 = vmatmul.f32.vlgmr.msrb.gmra.mxu1 %v593_v38  ;;  %v469_v39 = vpop.f32.mrf.mxu0 }
  0xfa   : > { %v498_v40 = vpop.f32.mrf.mxu1  ;;  %v541_v41 = vadd.f32 %v540_v33, %v469_v39  ;;  %v543_v45 = vpop.f32.mrf.mxu2 }
  0xfb   : > { %v570_v42 = vadd.f32 %v569_v36, %v498_v40 }
  0xfc   : > { %v586_v43 = vadd.f32 %v580_v27, %v541_v41  ;;  %v572_v46 = vpop.f32.mrf.mxu3 }
  0xfd   : > { %v587_v44 = vadd.f32 %v581_v28, %v570_v42 }
  0xfe   : > { %v594_v47 = vmax.f32 %v586_v43, 0.0 }
  0xff   : > { %v595_v48 = vmax.f32 %v587_v44, 0.0 }
 0x100   : > { %655 = vmatmul.f32.vlgmr.msrb.gmra.mxu2 %v594_v47 }
 0x101   : > { %684 = vmatmul.f32.vlgmr.msrb.gmra.mxu3 %v595_v48  ;;  %v472_v49 = vpop.f32.mrf.mxu0 }
 0x102   : > { %v501_v50 = vpop.f32.mrf.mxu1  ;;  %v544_v51 = vadd.f32 %v543_v45, %v472_v49  ;;  %v546_v58 = vpop.f32.mrf.mxu2 }
 0x103   : > { %v573_v52 = vadd.f32 %v572_v46, %v501_v50 }
 0x104   : > { %v588_v54 = vadd.f32 %v580_v27, %v544_v51  ;;  %v575_v59 = vpop.f32.mrf.mxu3 }
 0x105   : > { %v589_v55 = vadd.f32 %v581_v28, %v573_v52 }
 0x106   : > { %v596_v56 = vmax.f32 %v588_v54, 0.0 }
 0x107   : > { %v597_v57 = vmax.f32 %v589_v55, 0.0 }
 0x108   : > { %658 = vmatmul.f32.gmra.mxu2 %v596_v56 }
 0x109   : > { %687 = vmatmul.f32.gmra.mxu3 %v597_v57  ;;  %v475_v61 = vpop.f32.mrf.mxu0 }
 0x10a   : > { %v504_v62 = vpop.f32.mrf.mxu1  ;;  %v547_v63 = vadd.f32 %v546_v58, %v475_v61 }
 0x10b   : > { %v576_v0 = vadd.f32 %v575_v59, %v504_v62 }
 0x10c   : > { %v590_v1 = vadd.f32 %v580_v27, %v547_v63 }
 0x10d   : > { %v591_v2 = vadd.f32 %v581_v28, %v576_v0 }
 0x10e   : > { %v598_v3 = vmax.f32 %v590_v1, 0.0 }
 0x10f   : > { %v599_v4 = vmax.f32 %v591_v2, 0.0 }
 0x110   : > { %661 = vmatmul.f32.gmra.mxu2 %v598_v3 }
 0x111   : > { %690 = vmatmul.f32.gmra.mxu3 %v599_v4 }
 0x175   : > { %v653_v7 = vpop.f32.mrf.mxu0 }
 0x176   : > { %v682_v8 = vpop.f32.mrf.mxu1  ;;  %v654_v9 = vadd.f32 %v1081_v5, %v653_v7 }
 0x178   : > { %v683_v10 = vadd.f32 %v682_v8, %v654_v9 }
 0x17a   : > { %v949_v11 = vmul.f32 -1.442695, %v683_v10 }
 0x17c   : > { %1082 = vpow2.f32 %v949_v11 }
 0x182   : > { %v1083_v12 = vpop.eup %1082 }
 0x183   : > { %v706_v13 = vadd.f32 1.0, %v1083_v12  ;;  %v656_v15 = vpop.f32.mrf.mxu2 }
 0x184   : > { %v685_v16 = vpop.f32.mrf.mxu3  ;;  %v657_v17 = vadd.f32 %v1081_v5, %v656_v15 }
 0x185   : > { %1084 = vrcp.f32 %v706_v13  ;;  %v721_v27 = vand.u32 2147483648, %v706_v13  ;;  %v719_v30 = vand.u32 2147483647, %v706_v13  ;;  %vm715_vm2 = vweird.f32 %v706_v13 }
 0x186   : > { %v686_v18 = vadd.f32 %v685_v16, %v657_v17 }
 0x187   : > { %v722_v34 = vor.u32 1.1754944e-38, %v721_v27  ;;  %vm720_vm4 = vcmp.eq.f32.partialorder %v719_v30, 8.507059e+37 }
 0x188   : > { %v950_v19 = vmul.f32 -1.442695, %v686_v18 }
 0x18a   : > { %1086 = vpow2.f32 %v950_v19 }
 0x18b   : > { %v1085_v20 = vpop.eup %1084  ;;  %v659_v21 = vpop.f32.mrf.mxu2 }
 0x18c   : > { %v688_v22 = vpop.f32.mrf.mxu3  ;;  %v711_v23 = vmul.f32 %v1085_v20, %v706_v13  ;;  %v660_v24 = vadd.f32 %v1081_v5, %v659_v21  ;;  %vm716_vm1 = vweird.f32 %v1085_v20 }
 0x18d   : > { %vm717_vm3 = vmor %vm715_vm2, %vm716_vm1 }
 0x18e   : > { %v712_v25 = vsub.f32 1.0, %v711_v23  ;;  %v689_v26 = vadd.f32 %v688_v22, %v660_v24 }
 0x190   : > { %v1087_v28 = vpop.eup %1086  ;;  %v713_v29 = vmul.f32 %v1085_v20, %v712_v25  ;;  %v951_v31 = vmul.f32 -1.442695, %v689_v26 }
 0x191   : > { %v707_v32 = vadd.f32 1.0, %v1087_v28 }
 0x192   : > { %v714_v33 = vadd.f32 %v1085_v20, %v713_v29  ;;  %1088 = vpow2.f32 %v951_v31 }
 0x193   : > { %1090 = vrcp.f32 %v707_v32  ;;  %v662_v35 = vpop.f32.mrf.mxu2  ;;  %v736_v49 = vand.u32 2147483648, %v707_v32  ;;  %v734_v51 = vand.u32 2147483647, %v707_v32  ;;  %vm730_vm6 = vweird.f32 %v707_v32 }
 0x194   : > { %v691_v36 = vpop.f32.mrf.mxu3  ;;  %v718_v37 = vsel %vm717_vm3, %v1085_v20, %v714_v33  ;;  %v663_v38 = vadd.f32 %v1081_v5, %v662_v35 }
 0x195   : > { %v723_v39 = vsel %vm720_vm4, %v722_v34, %v718_v37  ;;  %vm735_vm8 = vcmp.eq.f32.partialorder %v734_v51, 8.507059e+37 }
 0x196   : > { %v770_v40 = vmul.f32 2.0, %v723_v39  ;;  %v692_v41 = vadd.f32 %v691_v36, %v663_v38 }
 0x198   : > { %v1089_v42 = vpop.eup %1088  ;;  %v774_v43 = vmul.f32 %v770_v40, %v1553_v53  ;;  %v952_v44 = vmul.f32 -1.442695, %v692_v41  ;;  %v737_v53 = vor.u32 1.1754944e-38, %v736_v49 }
 0x199   : > { %v1091_v45 = vpop.eup %1090  ;;  %v708_v46 = vadd.f32 1.0, %v1089_v42 }
 0x19a   : > { %v726_v47 = vmul.f32 %v1091_v45, %v707_v32  ;;  %1092 = vpow2.f32 %v952_v44  ;;  %778 = vst [vmem:[%s1587_s18] sm:$0xff] %v774_v43  ;;  %vm731_vm5 = vweird.f32 %v1091_v45 }
 0x19b   : > { %1094 = vrcp.f32 %v708_v46  ;;  %vm732_vm7 = vmor %vm730_vm6, %vm731_vm5  ;;  %v751_v63 = vand.u32 2147483648, %v708_v46  ;;  %v749_v2 = vand.u32 2147483647, %v708_v46  ;;  %vm745_vm10 = vweird.f32 %v708_v46 }
 0x19c   : > { %v727_v48 = vsub.f32 1.0, %v726_v47 }
 0x19d   : > { %v752_v5 = vor.u32 1.1754944e-38, %v751_v63  ;;  %vm750_vm12 = vcmp.eq.f32.partialorder %v749_v2, 8.507059e+37 }
 0x19e   : > { %v728_v50 = vmul.f32 %v1091_v45, %v727_v48 }
 0x1a0   : > { %v1093_v52 = vpop.eup %1092  ;;  %v729_v54 = vadd.f32 %v1091_v45, %v728_v50 }
 0x1a1   : > { %v1095_v55 = vpop.eup %1094  ;;  %v709_v56 = vadd.f32 1.0, %v1093_v52 }
 0x1a2   : > { %v733_v57 = vsel %vm732_vm7, %v1091_v45, %v729_v54  ;;  %v741_v58 = vmul.f32 %v1095_v55, %v708_v46  ;;  %vm746_vm9 = vweird.f32 %v1095_v55 }
 0x1a3   : > { %v738_v59 = vsel %vm735_vm8, %v737_v53, %v733_v57  ;;  %1096 = vrcp.f32 %v709_v56  ;;  %vm747_vm11 = vmor %vm745_vm10, %vm746_vm9  ;;  %v764_v15 = vand.u32 2147483647, %v709_v56  ;;  %vm760_vm14 = vweird.f32 %v709_v56 }
 0x1a4   : > { %v771_v61 = vmul.f32 2.0, %v738_v59  ;;  %v742_v62 = vsub.f32 1.0, %v741_v58 }
 0x1a5   : > { %vm765_vm0 = vcmp.eq.f32.partialorder %v764_v15, 8.507059e+37 }
 0x1a6   : > { %v775_v0 = vmul.f32 %v771_v61, %v1561_v60  ;;  %v743_v1 = vmul.f32 %v1095_v55, %v742_v62  ;;  %v766_v60 = vand.u32 2147483648, %v709_v56 }
 0x1a8   : > { %v744_v3 = vadd.f32 %v1095_v55, %v743_v1  ;;  %779 = vst [vmem:[%s1587_s18 + $0x8] sm:$0xff] %v775_v0  ;;  %v767_v17 = vor.u32 1.1754944e-38, %v766_v60 }
 0x1a9   : > { %v1097_v4 = vpop.eup %1096 }
 0x1aa   : > { %v748_v7 = vsel %vm747_vm11, %v1095_v55, %v744_v3  ;;  %v756_v8 = vmul.f32 %v1097_v4, %v709_v56  ;;  %vm761_vm13 = vweird.f32 %v1097_v4 }
 0x1ab   : > { %v753_v9 = vsel %vm750_vm12, %v752_v5, %v748_v7  ;;  %vm762_vm15 = vmor %vm760_vm14, %vm761_vm13 }
 0x1ac   : > { %v772_v10 = vmul.f32 2.0, %v753_v9  ;;  %v757_v11 = vsub.f32 1.0, %v756_v8 }
 0x1ae   : > { %v776_v12 = vmul.f32 %v772_v10, %v1569_v6  ;;  %v758_v13 = vmul.f32 %v1097_v4, %v757_v11 }
 0x1b0   : > { %v759_v16 = vadd.f32 %v1097_v4, %v758_v13  ;;  %780 = vst [vmem:[%s1587_s18 + $0x10] sm:$0xff] %v776_v12 }
 0x1b2   : > { %v763_v18 = vsel %vm762_vm15, %v1097_v4, %v759_v16 }
 0x1b3   : > { %v768_v6 = vsel %vm765_vm0, %v767_v17, %v763_v18 }
 0x1b4   : > { %v773_v19 = vmul.f32 2.0, %v768_v6 }
 0x1b6   : > { %v777_v20 = vmul.f32 %v773_v19, %v1575_v14 }
 0x1b8   : > { %781 = vst [vmem:[%s1587_s18 + $0x18] sm:$0xff] %v777_v20 }
 0x1b9   : > { %1275 = shalt.err (!%p1272_p11)
}
 0x1ba   : > { %s1335_s10 = smov 128   ;;  %s1336_s30 = smov 8  }
 0x1bb   : > { %1009 = dma.vmem_to_hbm [thread:$0]  (%p1463_p7), %s796_s28, 512, %s798_s14, %s783_s20, %s1335_s10, %s1335_s10, %s1336_s30  }
 0x1bc PF: > { %s812_s23 = sand.u32 1, %s1314_s24   ;;  %p1659_p12 = scmp.ge.s32.totalorder %s1326_s27, 2 }
 0x1bd   : > { %s813_s2 = scalar_lea.sflag [#allocation4], %s812_s23 }
 0x1be   : > { %p1029_p13 = pnand %p1659_p12, %p1412_p6 }
 0x1c0   : > { %p1030_p0 = pneg %p1029_p13 }
 0x1c2   : > { %1309 = dma.done.wait (%p1030_p0), %s813_s2, 512  }
 0x1c3   : > { %1311 = vsyncadd (%p1030_p0), %s813_s2, 4294966784  ;;  %s1660_s3 = sld [smem:[#allocation17_spill]]  ;;  %p24_p3 = scmp.ge.s32.totalorder %s1449_s16, 4  }
 0x1c4   : > { %s1661_s24 = smov %s1318_s25  ;;  %s1662_s25 = smov %s1322_s26 }
 0x1c5   : > { %s1664_s27 = smov %s1449_s16  ;;  %26 = sbr.rel (!%p24_p3) target bundleno = 13 (0xd), region = 118 }
 0x1c9   : > { %s1663_s26 = smov %s1660_s3 }
 0x1ca   :  { %819 = vsyncpa [#allocation3], 1 }
 0x1cb   :  { %821 = vsyncpa [#allocation3 + $0x1], 1 }
 0x1cc   :  { %822 = vsyncpa [#allocation6], 1 }
 0x1cd   :  { %824 = vsyncpa [#allocation6 + $0x1], 1 }
 0x1ce   :  { %825 = vsyncpa [#allocation9], 1 }
 0x1cf   :  { %826 = vsyncpa [#allocation4], 1 }
 0x1d0   :  { %828 = vsyncpa [#allocation4 + $0x1], 1 }

</bundles_post_ra>
